<compile_context>
chip_gen: v5e
topology: v5e:2x2
jax: 0.10.0
libtpu: 0.0.40
codegen_flags: <defaults>
</compile_context>

<pallas_src>
import functools
import math

import jax
import jax.numpy as jnp
from jax.experimental import pallas as pl
from jax.experimental.pallas import tpu as pltpu


def _round_up(x, m):
    return ((x + m - 1) // m) * m


def _vmem_budget_bytes():
    """Per-generation VMEM budget (conservative fraction of physical VMEM)."""
    try:
        cap = int(pltpu.get_tpu_info().vmem_capacity_bytes)
    except Exception:
        cap = 64 << 20  # conservative default (v7x physical VMEM per core)
    return max(16 << 20, int(0.70 * cap))


def _rnn_chunk_kernel(h0_ref, su_ref, Wt_ref, Bsut_ref, b_ref, Wzt_ref, bz_ref,
                      hseq_ref, zseq_ref, hstate, drive_scr, *, alpha, chunk):
    """One grid step = one (batch-tile, time-chunk).

    hstate (VMEM scratch) carries the hidden state across time chunks.  The
    carry relies on the time axis being the innermost, sequentially executed
    ("arbitrary") grid axis with the batch axis outermost -- do not reorder.
    """
    ci = pl.program_id(1)

    @pl.when(ci == 0)
    def _():
        hstate[...] = h0_ref[...]

    bt = su_ref.shape[0]
    sup = su_ref.shape[2]

    # --- Fused input drive for the whole chunk: one MXU matmul ---
    #   drive[b, t, :] = [s_t; u_t] @ [Bs; Bu].T + b
    su2d = su_ref[...].reshape(bt * chunk, sup)
    drive = (jnp.dot(su2d, Bsut_ref[...], preferred_element_type=jnp.float32)
             + b_ref[...])
    drive_scr[...] = drive.reshape(drive_scr.shape)

    # --- Recurrence over the chunk (chunk is a Python int -> static unroll,
    #     all slice offsets static).  Advancing past the true sequence length
    #     only touches padded output columns the wrapper slices away. ---
    h = hstate[...]
    for t in range(chunk):
        hseq_ref[:, t, :] = h  # log the state BEFORE the update (matches ref)
        pre = (jnp.dot(h, Wt_ref[...], preferred_element_type=jnp.float32)
               + drive_scr[:, t, :])
        h = (1.0 - alpha) * h + alpha * jnp.tanh(pre)
    hstate[...] = h

    # --- Fused readout z = Wz @ h + bz for the whole chunk ---
    hs2d = hseq_ref[...].reshape(bt * chunk, Wt_ref.shape[0])
    z = (jnp.dot(hs2d, Wzt_ref[...], preferred_element_type=jnp.float32)
         + bz_ref[...])
    zseq_ref[...] = z.reshape(zseq_ref.shape)


def rnn_forward(h0, s_seq, u_seq, W, b, Bs, Bu, Wz, bz, *, dt=0.1, tau=1.0,
                time_chunk=16):
    """h0: [B,H]; s_seq: [B,T,S]; u_seq: [B,T,U].

    Returns (h_seq [B,T,H], z_seq [B,T,Z]) matching RNN.forward.
    """
    B, H = h0.shape
    T = s_seq.shape[1]
    S = s_seq.shape[2]
    U = u_seq.shape[2]
    alpha = float(dt) / float(tau)
    f32 = jnp.float32

    h0 = h0.astype(f32)
    s_seq = s_seq.astype(f32)
    u_seq = u_seq.astype(f32)
    W = jnp.asarray(W, f32)
    b = jnp.asarray(b, f32).reshape(H)
    Bs = jnp.asarray(Bs, f32)
    Bu = jnp.asarray(Bu, f32)
    Wz = jnp.asarray(Wz, f32)
    Z = Wz.shape[0]
    bz = jnp.asarray(bz, f32).reshape(Z)

    # Lane/sublane-dense padded sizes.
    Hp = _round_up(H, 128)
    Zp = _round_up(Z, 128)
    SUp = _round_up(S + U, 128)
    Bp = _round_up(B, 8)

    # Split the batch onto two tensorcore tiles only when each tile keeps
    # plenty of MXU rows (gate on the TRUE batch size, not the padding).
    # Single-TC chips / small batches get one tile.
    nb = 2 if (B >= 128 and Bp % 16 == 0) else 1
    BT = Bp // nb

    # Derive the time chunk from the VMEM budget.  Working set:
    #   fixed   : resident weights (double-buffered) + h0 (x2) + hstate scratch
    #   per step: su in (x2) + hseq out (x2) + zseq out (x2) + drive scratch
    budget = _vmem_budget_bytes()
    fixed = 4 * (2 * (Hp * Hp + SUp * Hp + Hp * Zp + Hp + Zp) + 3 * BT * Hp)
    per_step = 4 * BT * (2 * SUp + 3 * Hp + 2 * Zp)
    max_chunk = max(8, (budget - fixed) // max(per_step, 1))
    chunk = int(min(time_chunk, max_chunk, _round_up(T, 8)))
    # Multiple of 8: keeps in-kernel reshapes layout-preserving; also bounds
    # the static unroll of the recurrence loop.
    chunk = max(8, (chunk // 8) * 8)
    Tp = _round_up(T, chunk)
    nt = Tp // chunk

    # Batch-major padded operands -- no wrapper-side transposes; the kernel
    # consumes and produces [B, T, ...] layouts directly.
    su = jnp.concatenate([s_seq, u_seq], axis=-1)                     # [B,T,S+U]
    su_p = jnp.zeros((Bp, Tp, SUp), f32).at[:B, :T, :S + U].set(su)
    h0_p = jnp.zeros((Bp, Hp), f32).at[:B, :H].set(h0)
    Wt_p = jnp.zeros((Hp, Hp), f32).at[:H, :H].set(W.T)
    Bsut_p = jnp.zeros((SUp, Hp), f32).at[:S + U, :H].set(
        jnp.concatenate([Bs, Bu], axis=1).T)
    b_p = jnp.zeros((1, Hp), f32).at[0, :H].set(b)
    Wzt_p = jnp.zeros((Hp, Zp), f32).at[:H, :Z].set(Wz.T)
    bz_p = jnp.zeros((1, Zp), f32).at[0, :Z].set(bz)

    kernel = functools.partial(_rnn_chunk_kernel, alpha=alpha, chunk=chunk)

    cost = pl.CostEstimate(
        flops=2 * Tp * Bp * Hp * (Hp + SUp + Zp),
        transcendentals=Tp * Bp * Hp,
        bytes_accessed=4 * (Bp * Tp * (SUp + Hp + Zp)
                            + Hp * Hp + SUp * Hp + Hp * Zp + Bp * Hp),
    )

    hseq_p, zseq_p = pl.pallas_call(
        kernel,
        out_shape=(jax.ShapeDtypeStruct((Bp, Tp, Hp), f32),
                   jax.ShapeDtypeStruct((Bp, Tp, Zp), f32)),
        grid_spec=pltpu.PrefetchScalarGridSpec(
            num_scalar_prefetch=0,
            grid=(nb, nt),
            in_specs=[
                pl.BlockSpec((BT, Hp), lambda bi, ci: (bi, 0)),              # h0
                pl.BlockSpec((BT, chunk, SUp), lambda bi, ci: (bi, ci, 0)),  # [s;u]
                pl.BlockSpec((Hp, Hp), lambda bi, ci: (0, 0)),               # W.T (resident)
                pl.BlockSpec((SUp, Hp), lambda bi, ci: (0, 0)),              # [Bs;Bu].T (resident)
                pl.BlockSpec((1, Hp), lambda bi, ci: (0, 0)),                # b
                pl.BlockSpec((Hp, Zp), lambda bi, ci: (0, 0)),               # Wz.T (resident)
                pl.BlockSpec((1, Zp), lambda bi, ci: (0, 0)),                # bz
            ],
            out_specs=[
                pl.BlockSpec((BT, chunk, Hp), lambda bi, ci: (bi, ci, 0)),   # h_seq
                pl.BlockSpec((BT, chunk, Zp), lambda bi, ci: (bi, ci, 0)),   # z_seq
            ],
            scratch_shapes=[
                pltpu.VMEM((BT, Hp), f32),          # hidden-state carry
                pltpu.VMEM((BT, chunk, Hp), f32),   # per-chunk input drive
            ],
        ),
        compiler_params=pltpu.CompilerParams(
            dimension_semantics=("parallel", "arbitrary"),
            vmem_limit_bytes=int(budget),
        ),
        cost_estimate=cost,
    )(h0_p, su_p, Wt_p, Bsut_p, b_p, Wzt_p, bz_p)

    h_seq = hseq_p[:B, :T, :H]
    z_seq = zseq_p[:B, :T, :Z]
    return h_seq, z_seq


def _ref_forward(h0, s_seq, u_seq, W, b, Bs, Bu, Wz, bz, dt, tau):
    """Pure-JAX reference mirroring RNN.forward."""
    alpha = dt / tau
    T = s_seq.shape[1]
    h = h0
    hs = [h0]
    for t in range(T - 1):
        pre = (h @ W.T + b[:, 0]
               + s_seq[:, t, :] @ Bs.T
               + u_seq[:, t, :] @ Bu.T)
        h = (1.0 - alpha) * h + alpha * jnp.tanh(pre)
        hs.append(h)
    h_seq = jnp.stack(hs, axis=1)
    z_seq = h_seq @ Wz.T + bz[:, 0]
    return h_seq, z_seq


if __name__ == "__main__":
    # Small shapes consistent with the module's forward signature.
    B, T = 2, 8
    dim_h, dim_s, dim_z = 32, 16, 8
    dim_u = dim_h  # default: dim_u = dim_u or dim_h
    gain, dt, tau = 1.0, 0.1, 1.0

    key = jax.random.PRNGKey(0)
    kW, kBs, kWz, kh0, ks, ku = jax.random.split(key, 6)

    # Deterministic parameter init matching the PyTorch __init__ distributions.
    W = (gain / math.sqrt(dim_h)) * jax.random.normal(kW, (dim_h, dim_h), jnp.float32)
    b = jnp.zeros((dim_h, 1), jnp.float32)
    Bs = (1.0 / math.sqrt(dim_s)) * jax.random.normal(kBs, (dim_h, dim_s), jnp.float32)
    Bu = jnp.eye(dim_h, dim_u, dtype=jnp.float32)          # nn.init.eye_ (frozen)
    Wz = (1.0 / math.sqrt(dim_z)) * jax.random.normal(kWz, (dim_z, dim_h), jnp.float32)
    bz = jnp.zeros((dim_z, 1), jnp.float32)

    # Inputs (forward defaults to zeros; here we exercise nonzero sequences).
    h0 = 0.1 * jax.random.normal(kh0, (B, dim_h), jnp.float32)
    s_seq = jax.random.normal(ks, (B, T, dim_s), jnp.float32)
    u_seq = jax.random.normal(ku, (B, T, dim_u), jnp.float32)

    h_seq, z_seq = rnn_forward(h0, s_seq, u_seq, W, b, Bs, Bu, Wz, bz, dt=dt, tau=tau)
    h_seq = jax.block_until_ready(h_seq)
    z_seq = jax.block_until_ready(z_seq)

    h_ref, z_ref = _ref_forward(h0, s_seq, u_seq, W, b, Bs, Bu, Wz, bz, dt, tau)

    assert h_seq.shape == (B, T, dim_h) and z_seq.shape == (B, T, dim_z)
    assert jnp.allclose(h_seq, h_ref, rtol=2e-3, atol=2e-3)
    assert jnp.allclose(z_seq, z_ref, rtol=2e-3, atol=2e-3)

    print("KERNEL_OK")
</pallas_src>

<mosaic_0001>
module attributes {stable_mosaic.version = 11 : i64} {
  func.func @_rnn_chunk_kernel(%arg0: i32, %arg1: i32, %arg2: memref<8x128xf32, #tpu.memory_space<vmem>>, %arg3: memref<8x8x128xf32, #tpu.memory_space<vmem>>, %arg4: memref<128x128xf32, #tpu.memory_space<vmem>>, %arg5: memref<128x128xf32, #tpu.memory_space<vmem>>, %arg6: memref<1x128xf32, #tpu.memory_space<vmem>>, %arg7: memref<128x128xf32, #tpu.memory_space<vmem>>, %arg8: memref<1x128xf32, #tpu.memory_space<vmem>>, %arg9: memref<8x8x128xf32, #tpu.memory_space<vmem>>, %arg10: memref<8x8x128xf32, #tpu.memory_space<vmem>>, %arg11: memref<8x128xf32, #tpu.memory_space<vmem>>, %arg12: memref<8x8x128xf32, #tpu.memory_space<vmem>>) attributes {dimension_semantics = [#tpu.dimension_semantics<parallel>, #tpu.dimension_semantics<arbitrary>], iteration_bounds = array<i64: 1, 1>, scalar_prefetch = 0 : i64, scratch_operands = 2 : i64, tpu.core_type = #tpu.core_type<tc>, window_params = [{transform_indices = @transform_0, window_bounds = array<i64: 8, 128>}, {transform_indices = @transform_1, window_bounds = array<i64: 8, 8, 128>}, {pipeline_mode = #tpu.pipeline_mode<synchronous>, transform_indices = @transform_2, window_bounds = array<i64: 128, 128>}, {pipeline_mode = #tpu.pipeline_mode<synchronous>, transform_indices = @transform_3, window_bounds = array<i64: 128, 128>}, {pipeline_mode = #tpu.pipeline_mode<synchronous>, transform_indices = @transform_4, window_bounds = array<i64: 1, 128>}, {pipeline_mode = #tpu.pipeline_mode<synchronous>, transform_indices = @transform_5, window_bounds = array<i64: 128, 128>}, {pipeline_mode = #tpu.pipeline_mode<synchronous>, transform_indices = @transform_6, window_bounds = array<i64: 1, 128>}, {transform_indices = @transform_7, window_bounds = array<i64: 8, 8, 128>}, {transform_indices = @transform_8, window_bounds = array<i64: 8, 8, 128>}]} {
    %c0_i32 = arith.constant 0 : i32
    %0 = arith.cmpi eq, %arg1, %c0_i32 : i32
    %1 = arith.extui %0 : i1 to i32
    %c0_i32_0 = arith.constant 0 : i32
    %2 = arith.cmpi ne, %1, %c0_i32_0 : i32
    scf.if %2 {
      %c0_106 = arith.constant 0 : index
      %c0_107 = arith.constant 0 : index
      %135 = vector.load %arg2[%c0_106, %c0_107] : memref<8x128xf32, #tpu.memory_space<vmem>>, vector<8x128xf32>
      %c0_108 = arith.constant 0 : index
      %c0_109 = arith.constant 0 : index
      %136 = vector.load %arg11[%c0_108, %c0_109] : memref<8x128xf32, #tpu.memory_space<vmem>>, vector<8x128xf32>
      tpu.vector_store %arg11[%c0_108, %c0_109], %135 {strides = array<i32>} : memref<8x128xf32, #tpu.memory_space<vmem>>, vector<8x128xf32>,
    } else {
    }
    %c0 = arith.constant 0 : index
    %c0_1 = arith.constant 0 : index
    %c0_2 = arith.constant 0 : index
    %3 = vector.load %arg3[%c0, %c0_1, %c0_2] : memref<8x8x128xf32, #tpu.memory_space<vmem>>, vector<8x8x128xf32>
    %4 = vector.shape_cast %3 : vector<8x8x128xf32> to vector<64x128xf32>
    %c0_3 = arith.constant 0 : index
    %c0_4 = arith.constant 0 : index
    %5 = vector.load %arg5[%c0_3, %c0_4] : memref<128x128xf32, #tpu.memory_space<vmem>>, vector<128x128xf32>
    %cst = arith.constant dense<0.000000e+00> : vector<64x128xf32>
    %6 = tpu.matmul %4, %5, %cst {dimension_numbers = #tpu.dot_dimension_numbers<[1], [0], [0], [1], [0, 0, 1, 1], [], []>} : vector<64x128xf32>, vector<128x128xf32>, vector<64x128xf32> -> vector<64x128xf32>
    %c0_5 = arith.constant 0 : index
    %c0_6 = arith.constant 0 : index
    %7 = vector.load %arg6[%c0_5, %c0_6] : memref<1x128xf32, #tpu.memory_space<vmem>>, vector<1x128xf32>
    %8 = vector.broadcast %7 : vector<1x128xf32> to vector<64x128xf32>
    %9 = arith.addf %6, %8 : vector<64x128xf32>
    %10 = vector.shape_cast %9 : vector<64x128xf32> to vector<8x8x128xf32>
    %c0_7 = arith.constant 0 : index
    %c0_8 = arith.constant 0 : index
    %c0_9 = arith.constant 0 : index
    %11 = vector.load %arg12[%c0_7, %c0_8, %c0_9] : memref<8x8x128xf32, #tpu.memory_space<vmem>>, vector<8x8x128xf32>
    tpu.vector_store %arg12[%c0_7, %c0_8, %c0_9], %10 {strides = array<i32>} : memref<8x8x128xf32, #tpu.memory_space<vmem>>, vector<8x8x128xf32>,
    %c0_10 = arith.constant 0 : index
    %c0_11 = arith.constant 0 : index
    %12 = vector.load %arg11[%c0_10, %c0_11] : memref<8x128xf32, #tpu.memory_space<vmem>>, vector<8x128xf32>
    %c0_12 = arith.constant 0 : index
    %c0_13 = arith.constant 0 : index
    %c0_14 = arith.constant 0 : index
    %13 = vector.load %arg9[%c0_12, %c0_13, %c0_14] : memref<8x8x128xf32, #tpu.memory_space<vmem>>, vector<8x1x128xf32>
    %14 = vector.shape_cast %13 : vector<8x1x128xf32> to vector<8x128xf32>
    %15 = vector.shape_cast %12 : vector<8x128xf32> to vector<8x1x128xf32>
    tpu.vector_store %arg9[%c0_12, %c0_13, %c0_14], %15 {strides = array<i32>} : memref<8x8x128xf32, #tpu.memory_space<vmem>>, vector<8x1x128xf32>,
    %c0_15 = arith.constant 0 : index
    %c0_16 = arith.constant 0 : index
    %16 = vector.load %arg4[%c0_15, %c0_16] : memref<128x128xf32, #tpu.memory_space<vmem>>, vector<128x128xf32>
    %cst_17 = arith.constant dense<0.000000e+00> : vector<8x128xf32>
    %17 = tpu.matmul %12, %16, %cst_17 {dimension_numbers = #tpu.dot_dimension_numbers<[1], [0], [0], [1], [0, 0, 1, 1], [], []>} : vector<8x128xf32>, vector<128x128xf32>, vector<8x128xf32> -> vector<8x128xf32>
    %c0_18 = arith.constant 0 : index
    %c0_19 = arith.constant 0 : index
    %c0_20 = arith.constant 0 : index
    %18 = vector.load %arg12[%c0_18, %c0_19, %c0_20] : memref<8x8x128xf32, #tpu.memory_space<vmem>>, vector<8x1x128xf32>
    %19 = vector.shape_cast %18 : vector<8x1x128xf32> to vector<8x128xf32>
    %20 = arith.addf %17, %19 : vector<8x128xf32>
    %cst_21 = arith.constant 0.899999976 : f32
    %21 = vector.broadcast %cst_21 : f32 to vector<8x128xf32>
    %22 = arith.mulf %21, %12 : vector<8x128xf32>
    %23 = math.tanh %20 : vector<8x128xf32>
    %cst_22 = arith.constant 1.000000e-01 : f32
    %24 = vector.broadcast %cst_22 : f32 to vector<8x128xf32>
    %25 = arith.mulf %24, %23 : vector<8x128xf32>
    %26 = arith.addf %22, %25 : vector<8x128xf32>
    %c0_23 = arith.constant 0 : index
    %c1 = arith.constant 1 : index
    %c0_24 = arith.constant 0 : index
    %27 = vector.load %arg9[%c0_23, %c1, %c0_24] : memref<8x8x128xf32, #tpu.memory_space<vmem>>, vector<8x1x128xf32>
    %28 = vector.shape_cast %27 : vector<8x1x128xf32> to vector<8x128xf32>
    %29 = vector.shape_cast %26 : vector<8x128xf32> to vector<8x1x128xf32>
    tpu.vector_store %arg9[%c0_23, %c1, %c0_24], %29 {strides = array<i32>} : memref<8x8x128xf32, #tpu.memory_space<vmem>>, vector<8x1x128xf32>,
    %c0_25 = arith.constant 0 : index
    %c0_26 = arith.constant 0 : index
    %30 = vector.load %arg4[%c0_25, %c0_26] : memref<128x128xf32, #tpu.memory_space<vmem>>, vector<128x128xf32>
    %cst_27 = arith.constant dense<0.000000e+00> : vector<8x128xf32>
    %31 = tpu.matmul %26, %30, %cst_27 {dimension_numbers = #tpu.dot_dimension_numbers<[1], [0], [0], [1], [0, 0, 1, 1], [], []>} : vector<8x128xf32>, vector<128x128xf32>, vector<8x128xf32> -> vector<8x128xf32>
    %c0_28 = arith.constant 0 : index
    %c1_29 = arith.constant 1 : index
    %c0_30 = arith.constant 0 : index
    %32 = vector.load %arg12[%c0_28, %c1_29, %c0_30] : memref<8x8x128xf32, #tpu.memory_space<vmem>>, vector<8x1x128xf32>
    %33 = vector.shape_cast %32 : vector<8x1x128xf32> to vector<8x128xf32>
    %34 = arith.addf %31, %33 : vector<8x128xf32>
    %cst_31 = arith.constant 0.899999976 : f32
    %35 = vector.broadcast %cst_31 : f32 to vector<8x128xf32>
    %36 = arith.mulf %35, %26 : vector<8x128xf32>
    %37 = math.tanh %34 : vector<8x128xf32>
    %cst_32 = arith.constant 1.000000e-01 : f32
    %38 = vector.broadcast %cst_32 : f32 to vector<8x128xf32>
    %39 = arith.mulf %38, %37 : vector<8x128xf32>
    %40 = arith.addf %36, %39 : vector<8x128xf32>
    %c0_33 = arith.constant 0 : index
    %c2 = arith.constant 2 : index
    %c0_34 = arith.constant 0 : index
    %41 = vector.load %arg9[%c0_33, %c2, %c0_34] : memref<8x8x128xf32, #tpu.memory_space<vmem>>, vector<8x1x128xf32>
    %42 = vector.shape_cast %41 : vector<8x1x128xf32> to vector<8x128xf32>
    %43 = vector.shape_cast %40 : vector<8x128xf32> to vector<8x1x128xf32>
    tpu.vector_store %arg9[%c0_33, %c2, %c0_34], %43 {strides = array<i32>} : memref<8x8x128xf32, #tpu.memory_space<vmem>>, vector<8x1x128xf32>,
    %c0_35 = arith.constant 0 : index
    %c0_36 = arith.constant 0 : index
    %44 = vector.load %arg4[%c0_35, %c0_36] : memref<128x128xf32, #tpu.memory_space<vmem>>, vector<128x128xf32>
    %cst_37 = arith.constant dense<0.000000e+00> : vector<8x128xf32>
    %45 = tpu.matmul %40, %44, %cst_37 {dimension_numbers = #tpu.dot_dimension_numbers<[1], [0], [0], [1], [0, 0, 1, 1], [], []>} : vector<8x128xf32>, vector<128x128xf32>, vector<8x128xf32> -> vector<8x128xf32>
    %c0_38 = arith.constant 0 : index
    %c2_39 = arith.constant 2 : index
    %c0_40 = arith.constant 0 : index
    %46 = vector.load %arg12[%c0_38, %c2_39, %c0_40] : memref<8x8x128xf32, #tpu.memory_space<vmem>>, vector<8x1x128xf32>
    %47 = vector.shape_cast %46 : vector<8x1x128xf32> to vector<8x128xf32>
    %48 = arith.addf %45, %47 : vector<8x128xf32>
    %cst_41 = arith.constant 0.899999976 : f32
    %49 = vector.broadcast %cst_41 : f32 to vector<8x128xf32>
    %50 = arith.mulf %49, %40 : vector<8x128xf32>
    %51 = math.tanh %48 : vector<8x128xf32>
    %cst_42 = arith.constant 1.000000e-01 : f32
    %52 = vector.broadcast %cst_42 : f32 to vector<8x128xf32>
    %53 = arith.mulf %52, %51 : vector<8x128xf32>
    %54 = arith.addf %50, %53 : vector<8x128xf32>
    %c0_43 = arith.constant 0 : index
    %c3 = arith.constant 3 : index
    %c0_44 = arith.constant 0 : index
    %55 = vector.load %arg9[%c0_43, %c3, %c0_44] : memref<8x8x128xf32, #tpu.memory_space<vmem>>, vector<8x1x128xf32>
    %56 = vector.shape_cast %55 : vector<8x1x128xf32> to vector<8x128xf32>
    %57 = vector.shape_cast %54 : vector<8x128xf32> to vector<8x1x128xf32>
    tpu.vector_store %arg9[%c0_43, %c3, %c0_44], %57 {strides = array<i32>} : memref<8x8x128xf32, #tpu.memory_space<vmem>>, vector<8x1x128xf32>,
    %c0_45 = arith.constant 0 : index
    %c0_46 = arith.constant 0 : index
    %58 = vector.load %arg4[%c0_45, %c0_46] : memref<128x128xf32, #tpu.memory_space<vmem>>, vector<128x128xf32>
    %cst_47 = arith.constant dense<0.000000e+00> : vector<8x128xf32>
    %59 = tpu.matmul %54, %58, %cst_47 {dimension_numbers = #tpu.dot_dimension_numbers<[1], [0], [0], [1], [0, 0, 1, 1], [], []>} : vector<8x128xf32>, vector<128x128xf32>, vector<8x128xf32> -> vector<8x128xf32>
    %c0_48 = arith.constant 0 : index
    %c3_49 = arith.constant 3 : index
    %c0_50 = arith.constant 0 : index
    %60 = vector.load %arg12[%c0_48, %c3_49, %c0_50] : memref<8x8x128xf32, #tpu.memory_space<vmem>>, vector<8x1x128xf32>
    %61 = vector.shape_cast %60 : vector<8x1x128xf32> to vector<8x128xf32>
    %62 = arith.addf %59, %61 : vector<8x128xf32>
    %cst_51 = arith.constant 0.899999976 : f32
    %63 = vector.broadcast %cst_51 : f32 to vector<8x128xf32>
    %64 = arith.mulf %63, %54 : vector<8x128xf32>
    %65 = math.tanh %62 : vector<8x128xf32>
    %cst_52 = arith.constant 1.000000e-01 : f32
    %66 = vector.broadcast %cst_52 : f32 to vector<8x128xf32>
    %67 = arith.mulf %66, %65 : vector<8x128xf32>
    %68 = arith.addf %64, %67 : vector<8x128xf32>
    %c0_53 = arith.constant 0 : index
    %c4 = arith.constant 4 : index
    %c0_54 = arith.constant 0 : index
    %69 = vector.load %arg9[%c0_53, %c4, %c0_54] : memref<8x8x128xf32, #tpu.memory_space<vmem>>, vector<8x1x128xf32>
    %70 = vector.shape_cast %69 : vector<8x1x128xf32> to vector<8x128xf32>
    %71 = vector.shape_cast %68 : vector<8x128xf32> to vector<8x1x128xf32>
    tpu.vector_store %arg9[%c0_53, %c4, %c0_54], %71 {strides = array<i32>} : memref<8x8x128xf32, #tpu.memory_space<vmem>>, vector<8x1x128xf32>,
    %c0_55 = arith.constant 0 : index
    %c0_56 = arith.constant 0 : index
    %72 = vector.load %arg4[%c0_55, %c0_56] : memref<128x128xf32, #tpu.memory_space<vmem>>, vector<128x128xf32>
    %cst_57 = arith.constant dense<0.000000e+00> : vector<8x128xf32>
    %73 = tpu.matmul %68, %72, %cst_57 {dimension_numbers = #tpu.dot_dimension_numbers<[1], [0], [0], [1], [0, 0, 1, 1], [], []>} : vector<8x128xf32>, vector<128x128xf32>, vector<8x128xf32> -> vector<8x128xf32>
    %c0_58 = arith.constant 0 : index
    %c4_59 = arith.constant 4 : index
    %c0_60 = arith.constant 0 : index
    %74 = vector.load %arg12[%c0_58, %c4_59, %c0_60] : memref<8x8x128xf32, #tpu.memory_space<vmem>>, vector<8x1x128xf32>
    %75 = vector.shape_cast %74 : vector<8x1x128xf32> to vector<8x128xf32>
    %76 = arith.addf %73, %75 : vector<8x128xf32>
    %cst_61 = arith.constant 0.899999976 : f32
    %77 = vector.broadcast %cst_61 : f32 to vector<8x128xf32>
    %78 = arith.mulf %77, %68 : vector<8x128xf32>
    %79 = math.tanh %76 : vector<8x128xf32>
    %cst_62 = arith.constant 1.000000e-01 : f32
    %80 = vector.broadcast %cst_62 : f32 to vector<8x128xf32>
    %81 = arith.mulf %80, %79 : vector<8x128xf32>
    %82 = arith.addf %78, %81 : vector<8x128xf32>
    %c0_63 = arith.constant 0 : index
    %c5 = arith.constant 5 : index
    %c0_64 = arith.constant 0 : index
    %83 = vector.load %arg9[%c0_63, %c5, %c0_64] : memref<8x8x128xf32, #tpu.memory_space<vmem>>, vector<8x1x128xf32>
    %84 = vector.shape_cast %83 : vector<8x1x128xf32> to vector<8x128xf32>
    %85 = vector.shape_cast %82 : vector<8x128xf32> to vector<8x1x128xf32>
    tpu.vector_store %arg9[%c0_63, %c5, %c0_64], %85 {strides = array<i32>} : memref<8x8x128xf32, #tpu.memory_space<vmem>>, vector<8x1x128xf32>,
    %c0_65 = arith.constant 0 : index
    %c0_66 = arith.constant 0 : index
    %86 = vector.load %arg4[%c0_65, %c0_66] : memref<128x128xf32, #tpu.memory_space<vmem>>, vector<128x128xf32>
    %cst_67 = arith.constant dense<0.000000e+00> : vector<8x128xf32>
    %87 = tpu.matmul %82, %86, %cst_67 {dimension_numbers = #tpu.dot_dimension_numbers<[1], [0], [0], [1], [0, 0, 1, 1], [], []>} : vector<8x128xf32>, vector<128x128xf32>, vector<8x128xf32> -> vector<8x128xf32>
    %c0_68 = arith.constant 0 : index
    %c5_69 = arith.constant 5 : index
    %c0_70 = arith.constant 0 : index
    %88 = vector.load %arg12[%c0_68, %c5_69, %c0_70] : memref<8x8x128xf32, #tpu.memory_space<vmem>>, vector<8x1x128xf32>
    %89 = vector.shape_cast %88 : vector<8x1x128xf32> to vector<8x128xf32>
    %90 = arith.addf %87, %89 : vector<8x128xf32>
    %cst_71 = arith.constant 0.899999976 : f32
    %91 = vector.broadcast %cst_71 : f32 to vector<8x128xf32>
    %92 = arith.mulf %91, %82 : vector<8x128xf32>
    %93 = math.tanh %90 : vector<8x128xf32>
    %cst_72 = arith.constant 1.000000e-01 : f32
    %94 = vector.broadcast %cst_72 : f32 to vector<8x128xf32>
    %95 = arith.mulf %94, %93 : vector<8x128xf32>
    %96 = arith.addf %92, %95 : vector<8x128xf32>
    %c0_73 = arith.constant 0 : index
    %c6 = arith.constant 6 : index
    %c0_74 = arith.constant 0 : index
    %97 = vector.load %arg9[%c0_73, %c6, %c0_74] : memref<8x8x128xf32, #tpu.memory_space<vmem>>, vector<8x1x128xf32>
    %98 = vector.shape_cast %97 : vector<8x1x128xf32> to vector<8x128xf32>
    %99 = vector.shape_cast %96 : vector<8x128xf32> to vector<8x1x128xf32>
    tpu.vector_store %arg9[%c0_73, %c6, %c0_74], %99 {strides = array<i32>} : memref<8x8x128xf32, #tpu.memory_space<vmem>>, vector<8x1x128xf32>,
    %c0_75 = arith.constant 0 : index
    %c0_76 = arith.constant 0 : index
    %100 = vector.load %arg4[%c0_75, %c0_76] : memref<128x128xf32, #tpu.memory_space<vmem>>, vector<128x128xf32>
    %cst_77 = arith.constant dense<0.000000e+00> : vector<8x128xf32>
    %101 = tpu.matmul %96, %100, %cst_77 {dimension_numbers = #tpu.dot_dimension_numbers<[1], [0], [0], [1], [0, 0, 1, 1], [], []>} : vector<8x128xf32>, vector<128x128xf32>, vector<8x128xf32> -> vector<8x128xf32>
    %c0_78 = arith.constant 0 : index
    %c6_79 = arith.constant 6 : index
    %c0_80 = arith.constant 0 : index
    %102 = vector.load %arg12[%c0_78, %c6_79, %c0_80] : memref<8x8x128xf32, #tpu.memory_space<vmem>>, vector<8x1x128xf32>
    %103 = vector.shape_cast %102 : vector<8x1x128xf32> to vector<8x128xf32>
    %104 = arith.addf %101, %103 : vector<8x128xf32>
    %cst_81 = arith.constant 0.899999976 : f32
    %105 = vector.broadcast %cst_81 : f32 to vector<8x128xf32>
    %106 = arith.mulf %105, %96 : vector<8x128xf32>
    %107 = math.tanh %104 : vector<8x128xf32>
    %cst_82 = arith.constant 1.000000e-01 : f32
    %108 = vector.broadcast %cst_82 : f32 to vector<8x128xf32>
    %109 = arith.mulf %108, %107 : vector<8x128xf32>
    %110 = arith.addf %106, %109 : vector<8x128xf32>
    %c0_83 = arith.constant 0 : index
    %c7 = arith.constant 7 : index
    %c0_84 = arith.constant 0 : index
    %111 = vector.load %arg9[%c0_83, %c7, %c0_84] : memref<8x8x128xf32, #tpu.memory_space<vmem>>, vector<8x1x128xf32>
    %112 = vector.shape_cast %111 : vector<8x1x128xf32> to vector<8x128xf32>
    %113 = vector.shape_cast %110 : vector<8x128xf32> to vector<8x1x128xf32>
    tpu.vector_store %arg9[%c0_83, %c7, %c0_84], %113 {strides = array<i32>} : memref<8x8x128xf32, #tpu.memory_space<vmem>>, vector<8x1x128xf32>,
    %c0_85 = arith.constant 0 : index
    %c0_86 = arith.constant 0 : index
    %114 = vector.load %arg4[%c0_85, %c0_86] : memref<128x128xf32, #tpu.memory_space<vmem>>, vector<128x128xf32>
    %cst_87 = arith.constant dense<0.000000e+00> : vector<8x128xf32>
    %115 = tpu.matmul %110, %114, %cst_87 {dimension_numbers = #tpu.dot_dimension_numbers<[1], [0], [0], [1], [0, 0, 1, 1], [], []>} : vector<8x128xf32>, vector<128x128xf32>, vector<8x128xf32> -> vector<8x128xf32>
    %c0_88 = arith.constant 0 : index
    %c7_89 = arith.constant 7 : index
    %c0_90 = arith.constant 0 : index
    %116 = vector.load %arg12[%c0_88, %c7_89, %c0_90] : memref<8x8x128xf32, #tpu.memory_space<vmem>>, vector<8x1x128xf32>
    %117 = vector.shape_cast %116 : vector<8x1x128xf32> to vector<8x128xf32>
    %118 = arith.addf %115, %117 : vector<8x128xf32>
    %cst_91 = arith.constant 0.899999976 : f32
    %119 = vector.broadcast %cst_91 : f32 to vector<8x128xf32>
    %120 = arith.mulf %119, %110 : vector<8x128xf32>
    %121 = math.tanh %118 : vector<8x128xf32>
    %cst_92 = arith.constant 1.000000e-01 : f32
    %122 = vector.broadcast %cst_92 : f32 to vector<8x128xf32>
    %123 = arith.mulf %122, %121 : vector<8x128xf32>
    %124 = arith.addf %120, %123 : vector<8x128xf32>
    %c0_93 = arith.constant 0 : index
    %c0_94 = arith.constant 0 : index
    %125 = vector.load %arg11[%c0_93, %c0_94] : memref<8x128xf32, #tpu.memory_space<vmem>>, vector<8x128xf32>
    tpu.vector_store %arg11[%c0_93, %c0_94], %124 {strides = array<i32>} : memref<8x128xf32, #tpu.memory_space<vmem>>, vector<8x128xf32>,
    %c0_95 = arith.constant 0 : index
    %c0_96 = arith.constant 0 : index
    %c0_97 = arith.constant 0 : index
    %126 = vector.load %arg9[%c0_95, %c0_96, %c0_97] : memref<8x8x128xf32, #tpu.memory_space<vmem>>, vector<8x8x128xf32>
    %127 = vector.shape_cast %126 : vector<8x8x128xf32> to vector<64x128xf32>
    %c0_98 = arith.constant 0 : index
    %c0_99 = arith.constant 0 : index
    %128 = vector.load %arg7[%c0_98, %c0_99] : memref<128x128xf32, #tpu.memory_space<vmem>>, vector<128x128xf32>
    %cst_100 = arith.constant dense<0.000000e+00> : vector<64x128xf32>
    %129 = tpu.matmul %127, %128, %cst_100 {dimension_numbers = #tpu.dot_dimension_numbers<[1], [0], [0], [1], [0, 0, 1, 1], [], []>} : vector<64x128xf32>, vector<128x128xf32>, vector<64x128xf32> -> vector<64x128xf32>
    %c0_101 = arith.constant 0 : index
    %c0_102 = arith.constant 0 : index
    %130 = vector.load %arg8[%c0_101, %c0_102] : memref<1x128xf32, #tpu.memory_space<vmem>>, vector<1x128xf32>
    %131 = vector.broadcast %130 : vector<1x128xf32> to vector<64x128xf32>
    %132 = arith.addf %129, %131 : vector<64x128xf32>
    %133 = vector.shape_cast %132 : vector<64x128xf32> to vector<8x8x128xf32>
    %c0_103 = arith.constant 0 : index
    %c0_104 = arith.constant 0 : index
    %c0_105 = arith.constant 0 : index
    %134 = vector.load %arg10[%c0_103, %c0_104, %c0_105] : memref<8x8x128xf32, #tpu.memory_space<vmem>>, vector<8x8x128xf32>
    tpu.vector_store %arg10[%c0_103, %c0_104, %c0_105], %133 {strides = array<i32>} : memref<8x8x128xf32, #tpu.memory_space<vmem>>, vector<8x8x128xf32>,
    return
  }
  func.func @transform_0(%arg0: i32, %arg1: i32) -> (i32, i32) {
    %c0_i32 = arith.constant 0 : i32
    %c0_i32_0 = arith.constant 0 : i32
    return %arg0, %c0_i32 : i32, i32
  }
  func.func @transform_1(%arg0: i32, %arg1: i32) -> (i32, i32, i32) {
    %c0_i32 = arith.constant 0 : i32
    %c0_i32_0 = arith.constant 0 : i32
    return %arg0, %arg1, %c0_i32 : i32, i32, i32
  }
  func.func @transform_2(%arg0: i32, %arg1: i32) -> (i32, i32) {
    %c0_i32 = arith.constant 0 : i32
    %c0_i32_0 = arith.constant 0 : i32
    %c0_i32_1 = arith.constant 0 : i32
    return %c0_i32, %c0_i32_0 : i32, i32
  }
  func.func @transform_3(%arg0: i32, %arg1: i32) -> (i32, i32) {
    %c0_i32 = arith.constant 0 : i32
    %c0_i32_0 = arith.constant 0 : i32
    %c0_i32_1 = arith.constant 0 : i32
    return %c0_i32, %c0_i32_0 : i32, i32
  }
  func.func @transform_4(%arg0: i32, %arg1: i32) -> (i32, i32) {
    %c0_i32 = arith.constant 0 : i32
    %c0_i32_0 = arith.constant 0 : i32
    %c0_i32_1 = arith.constant 0 : i32
    return %c0_i32, %c0_i32_0 : i32, i32
  }
  func.func @transform_5(%arg0: i32, %arg1: i32) -> (i32, i32) {
    %c0_i32 = arith.constant 0 : i32
    %c0_i32_0 = arith.constant 0 : i32
    %c0_i32_1 = arith.constant 0 : i32
    return %c0_i32, %c0_i32_0 : i32, i32
  }
  func.func @transform_6(%arg0: i32, %arg1: i32) -> (i32, i32) {
    %c0_i32 = arith.constant 0 : i32
    %c0_i32_0 = arith.constant 0 : i32
    %c0_i32_1 = arith.constant 0 : i32
    return %c0_i32, %c0_i32_0 : i32, i32
  }
  func.func @transform_7(%arg0: i32, %arg1: i32) -> (i32, i32, i32) {
    %c0_i32 = arith.constant 0 : i32
    %c0_i32_0 = arith.constant 0 : i32
    return %arg0, %arg1, %c0_i32 : i32, i32, i32
  }
  func.func @transform_8(%arg0: i32, %arg1: i32) -> (i32, i32, i32) {
    %c0_i32 = arith.constant 0 : i32
    %c0_i32_0 = arith.constant 0 : i32
    return %arg0, %arg1, %c0_i32 : i32, i32, i32
  }
}

</mosaic_0001>

<bundles_post_ra>
// kernel: tpu_custom_call.1
= control target key start
LH: loop header
LB: loop body
LE: loop exit
PB: predicated region body
PF: predicated region fallthrough
CT: control target
= control target key end

     0   :  { %14 = vsyncpa [#allocation5], 0  ;;  %s1614_s0 = inlined_call_operand.hbm [shape: f32[8,128], index: 0, kind: input, shape index: {}]   ;;  %s1615_s1 = inlined_call_operand.hbm [shape: f32[8,8,128], index: 1, kind: input, shape index: {}]   ;;  %s1616_s2 = inlined_call_operand.hbm [shape: f32[128,128], index: 2, kind: input, shape index: {}]   ;;  %s1617_s3 = inlined_call_operand.hbm [shape: f32[128,128], index: 3, kind: input, shape index: {}]   ;;  %s1618_s4 = inlined_call_operand.vmem [shape: f32[1,128], index: 4, kind: input, shape index: {}]   ;;  %s1619_s5 = inlined_call_operand.hbm [shape: f32[128,128], index: 5, kind: input, shape index: {}]   ;;  %s1620_s6 = inlined_call_operand.vmem [shape: f32[1,128], index: 6, kind: input, shape index: {}]   ;;  %s1621_s7 = inlined_call_operand.hbm [shape: f32[8,8,128], index: 7, kind: output, shape index: {0}]   ;;  %s1622_s8 = inlined_call_operand.hbm [shape: f32[8,8,128], index: 8, kind: output, shape index: {1}]  }
   0x1   :  { %15 = vsyncpa [#allocation8], 0 }
   0x2   :  { %16 = vsyncpa [#allocation11], 0 }
   0x3   :  { %17 = vsyncpa [#allocation6], 0  ;;  %s34_s29 = sshll.u32 %s1615_s1, 4  ;;  %s35_s29 = int_to_ptr.hbm [resolvable:$true] %s34_s29 }
   0x4   :  { %18 = vsyncpa [#allocation15], 0  ;;  %s1269_s30 = smov [#allocation7]   ;;  %s60_s12 = sshll.u32 %s1617_s3, 4  ;;  %s61_s12 = int_to_ptr.hbm [resolvable:$true] %s60_s12 }
   0x5   :  { %s36_s9 = sshll.u32 %s1269_s30, 4  ;;  %s1270_s13 = smov 128   ;;  %s37_s9 = int_to_ptr.vmem [resolvable:$true] %s36_s9 }
   0x6   :  { %s1271_s14 = smov 8   ;;  %s1272_s15 = smov [#allocation10]  }
   0x7   :  { %42 = dma.hbm_to_vmem [thread:$0]  %s35_s29, 1024, %s37_s9, [#allocation8], %s1270_s13, %s1270_s13, %s1271_s14  }
   0x8   :  { %s62_s16 = sshll.u32 %s1272_s15, 4  ;;  %s24_s18 = sshll.u32 %s1614_s0, 4  ;;  %s63_s16 = int_to_ptr.vmem [resolvable:$true] %s62_s16  ;;  %s25_s18 = int_to_ptr.hbm [resolvable:$true] %s24_s18 }
   0x9   :  { %68 = dma.hbm_to_vmem [thread:$0]  %s61_s12, 2048, %s63_s16, [#allocation11], %s1270_s13, %s1270_s13, %s1271_s14  }
   0xa   :  { %s47_s20 = sshll.u32 %s1616_s2, 4  ;;  %s1273_s21 = smov [#allocation4]   ;;  %s48_s20 = int_to_ptr.hbm [resolvable:$true] %s47_s20 }
   0xb   :  { %s26_s22 = sshll.u32 %s1273_s21, 4  ;;  %s1274_s23 = smov [#allocation9]   ;;  %s27_s22 = int_to_ptr.vmem [resolvable:$true] %s26_s22 }
   0xc   :  { %29 = dma.hbm_to_vmem [thread:$0]  %s25_s18, 128, %s27_s22, [#allocation5]  }
   0xd   :  { %s49_s24 = sshll.u32 %s1274_s23, 4  ;;  %s75_s0 = sshll.u32 %s1619_s5, 4  ;;  %s50_s24 = int_to_ptr.vmem [resolvable:$true] %s49_s24  ;;  %s76_s0 = int_to_ptr.hbm [resolvable:$true] %s75_s0 }
   0xe   :  { %55 = dma.hbm_to_vmem [thread:$0]  %s48_s20, 2048, %s50_s24, [#allocation8], %s1270_s13, %s1270_s13, %s1271_s14  }
   0xf   :  { %s1275_s27 = smov [#allocation12]  }
  0x10   :  { %s77_s28 = sshll.u32 %s1275_s27, 4  ;;  %s78_s28 = int_to_ptr.vmem [resolvable:$true] %s77_s28 }
  0x11   :  { %83 = dma.hbm_to_vmem [thread:$0]  %s76_s0, 2048, %s78_s28, [#allocation11], %s1270_s13, %s1270_s13, %s1271_s14  }
  0x12   :  { %1259 = dma.done.wait [#allocation5], 128  }
  0x13   :  { %1260 = vsyncadd [#allocation5], 4294967168 }
  0x14   :  { %1261 = dma.done.wait [#allocation8], 3072  }
  0x15   :  { %1262 = vsyncadd [#allocation8], 4294964224 }
  0x16   :  { %1263 = dma.done.wait [#allocation11], 4096  }
  0x17   :  { %1264 = vsyncadd [#allocation11], 4294963200  ;;  %v135_v0 = vld [vmem:[#allocation10 + $0x78] sm:$0xff]  ;;  %v134_v1 = vld [vmem:[#allocation10 + $0x70] sm:$0xff]  ;;  %vm246_vm0 = vcmask 1041409   ;;  %vm249_vm1 = vcmask 1042434  }
  0x18   :  { %140 = vmatpush.msra.mxu0 %v135_v0  ;;  %v133_v2 = vld [vmem:[#allocation10 + $0x68] sm:$0xff]  ;;  %v132_v3 = vld [vmem:[#allocation10 + $0x60] sm:$0xff]  ;;  %v131_v4 = vld [vmem:[#allocation10 + $0x58] sm:$0xff]  ;;  %vm252_vm2 = vcmask 1043459   ;;  %vm255_vm3 = vcmask 1044484   ;;  %vm258_vm4 = vcmask 1045509  }
  0x19   :  { %v130_v5 = vld [vmem:[#allocation10 + $0x50] sm:$0xff]  ;;  %v129_v6 = vld [vmem:[#allocation10 + $0x48] sm:$0xff]  ;;  %v128_v7 = vld [vmem:[#allocation10 + $0x40] sm:$0xff]  ;;  %vm261_vm5 = vcmask 1046534   ;;  %vm264_vm6 = vcmask 1047559   ;;  %s1033_s30 = sshll.u32 %s1621_s7, 4  ;;  %s1034_s30 = int_to_ptr.hbm [resolvable:$true] %s1033_s30 }
  0x1a   :  { %141 = vmatpush.msra.mxu0 %v134_v1  ;;  %v127_v8 = vld [vmem:[#allocation10 + $0x38] sm:$0xff]  ;;  %v126_v9 = vld [vmem:[#allocation10 + $0x30] sm:$0xff]  ;;  %v125_v10 = vld [vmem:[#allocation10 + $0x28] sm:$0xff]  ;;  %s1276_s9 = smov [#allocation13]   ;;  %s1046_s17 = sshll.u32 %s1622_s8, 4  ;;  %s1047_s17 = int_to_ptr.hbm [resolvable:$true] %s1046_s17 }
  0x1b   :  { %v124_v11 = vld [vmem:[#allocation10 + $0x20] sm:$0xff]  ;;  %v123_v12 = vld [vmem:[#allocation10 + $0x18] sm:$0xff]  ;;  %v122_v13 = vld [vmem:[#allocation10 + $0x10] sm:$0xff]  ;;  %s1031_s10 = sshll.u32 %s1276_s9, 4  ;;  %s1032_s10 = int_to_ptr.vmem [resolvable:$true] %s1031_s10 }
  0x1c   :  { %142 = vmatpush.msra.mxu0 %v133_v2  ;;  %v121_v14 = vld [vmem:[#allocation10 + $0x8] sm:$0xff]  ;;  %v120_v15 = vld [vmem:[#allocation10] sm:$0xff]  ;;  %v1350_v17 = vld [vmem:[#allocation9 + $0x78] sm:$0xff] }
  0x1d   :  { %v112_v16 = vld [vmem:[#allocation7] sm:$0xff]  ;;  %267 = vmatpush.msra.mxu1 %v1350_v17  ;;  %361 = vmatpush.msra.mxu3 %v1350_v17  ;;  %v113_v18 = vld [vmem:[#allocation7 + $0x8] sm:$0xff]  ;;  %v1356_v19 = vld [vmem:[#allocation9 + $0x70] sm:$0xff] }
  0x1e   :  { %143 = vmatpush.msra.mxu0 %v132_v3  ;;  %643 = vmatpush.msra.mxu2 %v1350_v17  ;;  %v1359_v20 = vld [vmem:[#allocation9 + $0x68] sm:$0xff]  ;;  %v1361_v21 = vld [vmem:[#allocation9 + $0x60] sm:$0xff]  ;;  %v1367_v22 = vld [vmem:[#allocation9 + $0x58] sm:$0xff] }
  0x1f   :  { %268 = vmatpush.msra.mxu1 %v1356_v19  ;;  %362 = vmatpush.msra.mxu3 %v1356_v19  ;;  %v114_v23 = vld [vmem:[#allocation7 + $0x10] sm:$0xff]  ;;  %v1382_v25 = vld [vmem:[#allocation9 + $0x48] sm:$0xff]  ;;  %v1384_v26 = vld [vmem:[#allocation9 + $0x40] sm:$0xff] }
  0x20   :  { %144 = vmatpush.msra.mxu0 %v131_v4  ;;  %644 = vmatpush.msra.mxu2 %v1356_v19  ;;  %v1377_v24 = vld [vmem:[#allocation9 + $0x50] sm:$0xff]  ;;  %v1390_v27 = vld [vmem:[#allocation9 + $0x38] sm:$0xff]  ;;  %v1405_v30 = vld [vmem:[#allocation9 + $0x28] sm:$0xff] }
  0x21   :  { %269 = vmatpush.msra.mxu1 %v1359_v20  ;;  %363 = vmatpush.msra.mxu3 %v1359_v20  ;;  %v115_v28 = vld [vmem:[#allocation7 + $0x18] sm:$0xff]  ;;  %v1400_v29 = vld [vmem:[#allocation9 + $0x30] sm:$0xff]  ;;  %v1407_v31 = vld [vmem:[#allocation9 + $0x20] sm:$0xff] }
  0x22   :  { %145 = vmatpush.msra.mxu0 %v130_v5  ;;  %645 = vmatpush.msra.mxu2 %v1359_v20  ;;  %v1412_v32 = vld [vmem:[#allocation4] sm:$0xff]  ;;  %v116_v34 = vld [vmem:[#allocation7 + $0x20] sm:$0xff]  ;;  %v1422_v35 = vld [vmem:[#allocation9 + $0x10] sm:$0xff] }
  0x23   :  { %270 = vmatpush.msra.mxu1 %v1361_v21  ;;  %364 = vmatpush.msra.mxu3 %v1361_v21  ;;  %v1415_v33 = vld [vmem:[#allocation9 + $0x18] sm:$0xff]  ;;  %205 = vst [vmem:[#allocation13] sm:$0x1] %v1412_v32  ;;  %v1428_v36 = vld [vmem:[#allocation9 + $0x8] sm:$0xff]  ;;  %v1433_v37 = vld [vmem:[#allocation9] sm:$0xff] }
  0x24   :  { %146 = vmatpush.msra.mxu0 %v129_v6  ;;  %646 = vmatpush.msra.mxu2 %v1361_v21  ;;  %v117_v38 = vld [vmem:[#allocation7 + $0x28] sm:$0xff]  ;;  %v118_v39 = vld [vmem:[#allocation7 + $0x30] sm:$0xff]  ;;  %v119_v40 = vld [vmem:[#allocation7 + $0x38] sm:$0xff] }
  0x25   :  { %271 = vmatpush.msra.mxu1 %v1367_v22  ;;  %365 = vmatpush.msra.mxu3 %v1367_v22  ;;  %v1501_v41 = vld [vmem:[%s1618_s4] ss:$0 sm:$0xff] }
  0x26   :  { %147 = vmatpush.msra.mxu0 %v128_v7  ;;  %647 = vmatpush.msra.mxu2 %v1367_v22 }
  0x27   :  { %272 = vmatpush.msra.mxu1 %v1377_v24  ;;  %366 = vmatpush.msra.mxu3 %v1377_v24 }
  0x28   :  { %148 = vmatpush.msra.mxu0 %v127_v8  ;;  %648 = vmatpush.msra.mxu2 %v1377_v24 }
  0x29   :  { %273 = vmatpush.msra.mxu1 %v1382_v25  ;;  %367 = vmatpush.msra.mxu3 %v1382_v25 }
  0x2a   :  { %149 = vmatpush.msra.mxu0 %v126_v9  ;;  %649 = vmatpush.msra.mxu2 %v1382_v25 }
  0x2b   :  { %274 = vmatpush.msra.mxu1 %v1384_v26  ;;  %368 = vmatpush.msra.mxu3 %v1384_v26 }
  0x2c   :  { %150 = vmatpush.msra.mxu0 %v125_v10  ;;  %650 = vmatpush.msra.mxu2 %v1384_v26 }
  0x2d   :  { %275 = vmatpush.msra.mxu1 %v1390_v27  ;;  %369 = vmatpush.msra.mxu3 %v1390_v27 }
  0x2e   :  { %151 = vmatpush.msra.mxu0 %v124_v11  ;;  %651 = vmatpush.msra.mxu2 %v1390_v27 }
  0x2f   :  { %276 = vmatpush.msra.mxu1 %v1400_v29  ;;  %370 = vmatpush.msra.mxu3 %v1400_v29 }
  0x30   :  { %152 = vmatpush.msra.mxu0 %v123_v12  ;;  %652 = vmatpush.msra.mxu2 %v1400_v29 }
  0x31   :  { %277 = vmatpush.msra.mxu1 %v1405_v30  ;;  %371 = vmatpush.msra.mxu3 %v1405_v30 }
  0x32   :  { %153 = vmatpush.msra.mxu0 %v122_v13  ;;  %653 = vmatpush.msra.mxu2 %v1405_v30 }
  0x33   :  { %278 = vmatpush.msra.mxu1 %v1407_v31  ;;  %372 = vmatpush.msra.mxu3 %v1407_v31 }
  0x34   :  { %154 = vmatpush.msra.mxu0 %v121_v14  ;;  %654 = vmatpush.msra.mxu2 %v1407_v31 }
  0x35   :  { %279 = vmatpush.msra.mxu1 %v1415_v33  ;;  %373 = vmatpush.msra.mxu3 %v1415_v33 }
  0x36   :  { %155 = vmatpush.msra.mxu0 %v120_v15  ;;  %655 = vmatpush.msra.mxu2 %v1415_v33 }
  0x37   :  { %156 = vmatmul.f32.vlgmr.msra.gmra.mxu0 %v112_v16  ;;  %280 = vmatpush.msra.mxu1 %v1422_v35 }
  0x38   :  { %831 = vmatpush.msrb.mxu0 %v1350_v17  ;;  %374 = vmatpush.msra.mxu3 %v1422_v35 }
  0x39   :  { %656 = vmatpush.msra.mxu2 %v1422_v35  ;;  %281 = vmatpush.msra.mxu1 %v1428_v36 }
  0x3a   :  { %832 = vmatpush.msrb.mxu0 %v1356_v19  ;;  %375 = vmatpush.msra.mxu3 %v1428_v36 }
  0x3b   :  { %657 = vmatpush.msra.mxu2 %v1428_v36  ;;  %282 = vmatpush.msra.mxu1 %v1433_v37 }
  0x3c   :  { %833 = vmatpush.msrb.mxu0 %v1359_v20  ;;  %283 = vmatmul.f32.vlgmr.msra.gmra.mxu1 %v1412_v32 }
  0x3d   :  { %376 = vmatpush.msra.mxu3 %v1433_v37  ;;  %549 = vmatpush.msrb.mxu1 %v1350_v17 }
  0x3e   :  { %834 = vmatpush.msrb.mxu0 %v1361_v21  ;;  %658 = vmatpush.msra.mxu2 %v1433_v37 }
  0x3f   :  { %159 = vmatmul.f32.gmra.mxu0 %v113_v18  ;;  %455 = vmatpush.msrb.mxu3 %v1350_v17 }
  0x40   :  { %835 = vmatpush.msrb.mxu0 %v1367_v22  ;;  %550 = vmatpush.msrb.mxu1 %v1356_v19 }
  0x41   :  { %456 = vmatpush.msrb.mxu3 %v1356_v19 }
  0x42   :  { %836 = vmatpush.msrb.mxu0 %v1377_v24  ;;  %551 = vmatpush.msrb.mxu1 %v1359_v20 }
  0x43   :  { %457 = vmatpush.msrb.mxu3 %v1359_v20 }
  0x44   :  { %837 = vmatpush.msrb.mxu0 %v1382_v25  ;;  %552 = vmatpush.msrb.mxu1 %v1361_v21 }
  0x45   :  { %458 = vmatpush.msrb.mxu3 %v1361_v21 }
  0x46   :  { %838 = vmatpush.msrb.mxu0 %v1384_v26  ;;  %553 = vmatpush.msrb.mxu1 %v1367_v22 }
  0x47   :  { %162 = vmatmul.f32.gmra.mxu0 %v114_v23  ;;  %459 = vmatpush.msrb.mxu3 %v1367_v22 }
  0x48   :  { %839 = vmatpush.msrb.mxu0 %v1390_v27  ;;  %554 = vmatpush.msrb.mxu1 %v1377_v24 }
  0x49   :  { %460 = vmatpush.msrb.mxu3 %v1377_v24 }
  0x4a   :  { %840 = vmatpush.msrb.mxu0 %v1400_v29  ;;  %555 = vmatpush.msrb.mxu1 %v1382_v25 }
  0x4b   :  { %461 = vmatpush.msrb.mxu3 %v1382_v25 }
  0x4c   :  { %841 = vmatpush.msrb.mxu0 %v1405_v30  ;;  %556 = vmatpush.msrb.mxu1 %v1384_v26 }
  0x4d   :  { %462 = vmatpush.msrb.mxu3 %v1384_v26 }
  0x4e   :  { %842 = vmatpush.msrb.mxu0 %v1407_v31  ;;  %557 = vmatpush.msrb.mxu1 %v1390_v27 }
  0x4f   :  { %165 = vmatmul.f32.gmra.mxu0 %v115_v28  ;;  %463 = vmatpush.msrb.mxu3 %v1390_v27 }
  0x50   :  { %843 = vmatpush.msrb.mxu0 %v1415_v33  ;;  %558 = vmatpush.msrb.mxu1 %v1400_v29 }
  0x51   :  { %464 = vmatpush.msrb.mxu3 %v1400_v29 }
  0x52   :  { %844 = vmatpush.msrb.mxu0 %v1422_v35  ;;  %559 = vmatpush.msrb.mxu1 %v1405_v30 }
  0x53   :  { %465 = vmatpush.msrb.mxu3 %v1405_v30 }
  0x54   :  { %845 = vmatpush.msrb.mxu0 %v1428_v36  ;;  %560 = vmatpush.msrb.mxu1 %v1407_v31 }
  0x55   :  { %466 = vmatpush.msrb.mxu3 %v1407_v31 }
  0x56   :  { %846 = vmatpush.msrb.mxu0 %v1433_v37  ;;  %561 = vmatpush.msrb.mxu1 %v1415_v33 }
  0x57   :  { %168 = vmatmul.f32.gmra.mxu0 %v116_v34  ;;  %467 = vmatpush.msrb.mxu3 %v1415_v33 }
  0x58   :  { %562 = vmatpush.msrb.mxu1 %v1422_v35 }
  0x59   :  { %468 = vmatpush.msrb.mxu3 %v1422_v35 }
  0x5a   :  { %563 = vmatpush.msrb.mxu1 %v1428_v36 }
  0x5b   :  { %469 = vmatpush.msrb.mxu3 %v1428_v36 }
  0x5c   :  { %564 = vmatpush.msrb.mxu1 %v1433_v37 }
  0x5d   :  { %470 = vmatpush.msrb.mxu3 %v1433_v37 }
  0x5e   :  { %925 = vmatpush.msra.mxu1 %v1350_v17 }
  0x5f   :  { %171 = vmatmul.f32.gmra.mxu0 %v117_v38 }
  0x60   :  { %926 = vmatpush.msra.mxu1 %v1356_v19 }
  0x62   :  { %927 = vmatpush.msra.mxu1 %v1359_v20 }
  0x64   :  { %928 = vmatpush.msra.mxu1 %v1361_v21 }
  0x66   :  { %929 = vmatpush.msra.mxu1 %v1367_v22 }
  0x67   :  { %174 = vmatmul.f32.gmra.mxu0 %v118_v39 }
  0x68   :  { %930 = vmatpush.msra.mxu1 %v1377_v24 }
  0x6a   :  { %931 = vmatpush.msra.mxu1 %v1382_v25 }
  0x6c   :  { %932 = vmatpush.msra.mxu1 %v1384_v26 }
  0x6e   :  { %933 = vmatpush.msra.mxu1 %v1390_v27 }
  0x6f   :  { %177 = vmatmul.f32.gmra.mxu0 %v119_v40 }
  0x70   :  { %934 = vmatpush.msra.mxu1 %v1400_v29 }
  0x72   :  { %935 = vmatpush.msra.mxu1 %v1405_v30 }
  0x74   :  { %936 = vmatpush.msra.mxu1 %v1407_v31 }
  0x76   :  { %937 = vmatpush.msra.mxu1 %v1415_v33 }
  0x78   :  { %938 = vmatpush.msra.mxu1 %v1422_v35 }
  0x7a   :  { %939 = vmatpush.msra.mxu1 %v1428_v36 }
  0x7c   :  { %940 = vmatpush.msra.mxu1 %v1433_v37 }
  0xb4   :  { %v157_v42 = vpop.f32.mrf.mxu0 }
  0xb5   :  { %v158_v43 = vadd.f32 %v1501_v41, %v157_v42 }
  0xb7   :  { %181 = vst [vmem:[#allocation3] sm:$0xff] %v158_v43 }
  0xbc   :  { %v160_v44 = vpop.f32.mrf.mxu0 }
  0xbd   :  { %v161_v45 = vadd.f32 %v1501_v41, %v160_v44 }
  0xbe   :  { %v330_v58 = vld [vmem:[#allocation3 + $0x1] sm:$0x1]  ;;  %v424_v59 = vld [vmem:[#allocation3 + $0x2] sm:$0x1]  ;;  %v518_v63 = vld [vmem:[#allocation3 + $0x3] sm:$0x1] }
  0xbf   :  { %182 = vst [vmem:[#allocation3 + $0x8] sm:$0xff] %v161_v45  ;;  %v612_v14 = vld [vmem:[#allocation3 + $0x4] sm:$0x1]  ;;  %v706_v28 = vld [vmem:[#allocation3 + $0x5] sm:$0x1] }
  0xc0   :  { %v800_v38 = vld [vmem:[#allocation3 + $0x6] sm:$0x1] }
  0xc4   :  { %v163_v46 = vpop.f32.mrf.mxu0 }
  0xc5   :  { %v164_v47 = vadd.f32 %v1501_v41, %v163_v46 }
  0xc6   :  { %v331_v48 = vld [vmem:[#allocation3 + $0x9] sm:$0x1]  ;;  %v425_v49 = vld [vmem:[#allocation3 + $0xa] sm:$0x1]  ;;  %v519_v50 = vld [vmem:[#allocation3 + $0xb] sm:$0x1] }
  0xc7   :  { %183 = vst [vmem:[#allocation3 + $0x10] sm:$0xff] %v164_v47  ;;  %v613_v51 = vld [vmem:[#allocation3 + $0xc] sm:$0x1]  ;;  %v707_v52 = vld [vmem:[#allocation3 + $0xd] sm:$0x1]  ;;  %v346_v54 = vrot.slane %v331_v48, 7 }
  0xc8   :  { %v440_v55 = vrot.slane %v425_v49, 7  ;;  %v801_v56 = vld [vmem:[#allocation3 + $0xe] sm:$0x1]  ;;  %v534_v60 = vrot.slane %v519_v50, 7  ;;  %v628_v0 = vrot.slane %v613_v51, 7  ;;  %v722_v1 = vrot.slane %v707_v52, 7 }
  0xc9   :  { %v816_v5 = vrot.slane %v801_v56, 7  ;;  %v347_v6 = vsel %vm246_vm0, %v346_v54, %v330_v58 }
  0xca   :  { %v441_v7 = vsel %vm246_vm0, %v440_v55, %v424_v59  ;;  %v535_v13 = vsel %vm246_vm0, %v534_v60, %v518_v63  ;;  %v629_v23 = vsel %vm246_vm0, %v628_v0, %v612_v14  ;;  %v723_v42 = vsel %vm246_vm0, %v722_v1, %v706_v28 }
  0xcb   :  { %v817_v43 = vsel %vm246_vm0, %v816_v5, %v800_v38 }
  0xcc   :  { %v166_v53 = vpop.f32.mrf.mxu0 }
  0xcd   :  { %v167_v57 = vadd.f32 %v1501_v41, %v166_v53 }
  0xce   :  { %v332_v61 = vld [vmem:[#allocation3 + $0x11] sm:$0x1]  ;;  %v426_v62 = vld [vmem:[#allocation3 + $0x12] sm:$0x1]  ;;  %v520_v4 = vld [vmem:[#allocation3 + $0x13] sm:$0x1] }
  0xcf   :  { %184 = vst [vmem:[#allocation3 + $0x18] sm:$0xff] %v167_v57  ;;  %v348_v2 = vrot.slane %v332_v61, 6  ;;  %v442_v3 = vrot.slane %v426_v62, 6  ;;  %v536_v8 = vrot.slane %v520_v4, 6  ;;  %v614_v9 = vld [vmem:[#allocation3 + $0x14] sm:$0x1] }
  0xd0   :  { %v708_v10 = vld [vmem:[#allocation3 + $0x15] sm:$0x1]  ;;  %v630_v15 = vrot.slane %v614_v9, 6  ;;  %v802_v16 = vld [vmem:[#allocation3 + $0x16] sm:$0x1] }
  0xd1   :  { %v349_v11 = vsel %vm249_vm1, %v348_v2, %v347_v6  ;;  %v443_v12 = vsel %vm249_vm1, %v442_v3, %v441_v7  ;;  %v537_v18 = vsel %vm249_vm1, %v536_v8, %v535_v13  ;;  %v724_v34 = vrot.slane %v708_v10, 6 }
  0xd2   :  { %v818_v39 = vrot.slane %v802_v16, 6  ;;  %v631_v40 = vsel %vm249_vm1, %v630_v15, %v629_v23 }
  0xd3   :  { %v725_v45 = vsel %vm249_vm1, %v724_v34, %v723_v42 }
  0xd4   :  { %v169_v44 = vpop.f32.mrf.mxu0  ;;  %v819_v46 = vsel %vm249_vm1, %v818_v39, %v817_v43 }
  0xd5   :  { %v170_v47 = vadd.f32 %v1501_v41, %v169_v44 }
  0xd6   :  { %v333_v48 = vld [vmem:[#allocation3 + $0x19] sm:$0x1]  ;;  %v427_v49 = vld [vmem:[#allocation3 + $0x1a] sm:$0x1]  ;;  %v521_v52 = vld [vmem:[#allocation3 + $0x1b] sm:$0x1] }
  0xd7   :  { %185 = vst [vmem:[#allocation3 + $0x20] sm:$0xff] %v170_v47  ;;  %v350_v50 = vrot.slane %v333_v48, 5  ;;  %v444_v51 = vrot.slane %v427_v49, 5  ;;  %v615_v53 = vld [vmem:[#allocation3 + $0x1c] sm:$0x1]  ;;  %v538_v57 = vrot.slane %v521_v52, 5 }
  0xd8   :  { %v709_v54 = vld [vmem:[#allocation3 + $0x1d] sm:$0x1]  ;;  %v803_v58 = vld [vmem:[#allocation3 + $0x1e] sm:$0x1]  ;;  %v632_v59 = vrot.slane %v615_v53, 5 }
  0xd9   :  { %v351_v55 = vsel %vm252_vm2, %v350_v50, %v349_v11  ;;  %v445_v56 = vsel %vm252_vm2, %v444_v51, %v443_v12  ;;  %v726_v60 = vrot.slane %v709_v54, 5  ;;  %v820_v61 = vrot.slane %v803_v58, 5 }
  0xda   :  { %v539_v62 = vsel %vm252_vm2, %v538_v57, %v537_v18  ;;  %v633_v0 = vsel %vm252_vm2, %v632_v59, %v631_v40  ;;  %v230_v59 = vld [vmem:[#allocation3 + $0x8] sm:$0x1] }
  0xdb   :  { %v727_v1 = vsel %vm252_vm2, %v726_v60, %v725_v45  ;;  %v821_v2 = vsel %vm252_vm2, %v820_v61, %v819_v46  ;;  %v231_v60 = vld [vmem:[#allocation3 + $0x10] sm:$0x1] }
  0xdc   :  { %v172_v63 = vpop.f32.mrf.mxu0 }
  0xdd   :  { %v173_v3 = vadd.f32 %v1501_v41, %v172_v63 }
  0xde   :  { %v334_v4 = vld [vmem:[#allocation3 + $0x21] sm:$0x1]  ;;  %v428_v5 = vld [vmem:[#allocation3 + $0x22] sm:$0x1]  ;;  %v522_v8 = vld [vmem:[#allocation3 + $0x23] sm:$0x1] }
  0xdf   :  { %186 = vst [vmem:[#allocation3 + $0x28] sm:$0xff] %v173_v3  ;;  %v352_v6 = vrot.slane %v334_v4, 4  ;;  %v446_v7 = vrot.slane %v428_v5, 4  ;;  %v540_v9 = vrot.slane %v522_v8, 4  ;;  %v616_v10 = vld [vmem:[#allocation3 + $0x24] sm:$0x1] }
  0xe0   :  { %v710_v11 = vld [vmem:[#allocation3 + $0x25] sm:$0x1]  ;;  %v634_v14 = vrot.slane %v616_v10, 4  ;;  %v804_v15 = vld [vmem:[#allocation3 + $0x26] sm:$0x1]  ;;  %v245_v5 = vrot.slane %v230_v59, 7 }
  0xe1   :  { %v353_v12 = vsel %vm255_vm3, %v352_v6, %v351_v55  ;;  %v447_v13 = vsel %vm255_vm3, %v446_v7, %v445_v56  ;;  %v541_v16 = vsel %vm255_vm3, %v540_v9, %v539_v62  ;;  %v728_v18 = vrot.slane %v710_v11, 4 }
  0xe2   :  { %v822_v23 = vrot.slane %v804_v15, 4  ;;  %v635_v28 = vsel %vm255_vm3, %v634_v14, %v633_v0  ;;  %v232_v0 = vld [vmem:[#allocation3 + $0x18] sm:$0x1]  ;;  %v248_v9 = vrot.slane %v231_v60, 6 }
  0xe3   :  { %v729_v38 = vsel %vm255_vm3, %v728_v18, %v727_v1  ;;  %v233_v1 = vld [vmem:[#allocation3 + $0x20] sm:$0x1]  ;;  %v251_v14 = vrot.slane %v232_v0, 5 }
  0xe4   :  { %v175_v34 = vpop.f32.mrf.mxu0  ;;  %v823_v39 = vsel %vm255_vm3, %v822_v23, %v821_v2  ;;  %v229_v23 = vld [vmem:[#allocation3] sm:$0x1] }
  0xe5   :  { %v176_v40 = vadd.f32 %v1501_v41, %v175_v34 }
  0xe6   :  { %v335_v42 = vld [vmem:[#allocation3 + $0x29] sm:$0x1]  ;;  %v429_v43 = vld [vmem:[#allocation3 + $0x2a] sm:$0x1]  ;;  %v523_v46 = vld [vmem:[#allocation3 + $0x2b] sm:$0x1] }
  0xe7   :  { %187 = vst [vmem:[#allocation3 + $0x30] sm:$0xff] %v176_v40  ;;  %v354_v44 = vrot.slane %v335_v42, 3  ;;  %v448_v45 = vrot.slane %v429_v43, 3  ;;  %v542_v47 = vrot.slane %v523_v46, 3  ;;  %v617_v48 = vld [vmem:[#allocation3 + $0x2c] sm:$0x1]  ;;  %v247_v40 = vsel %vm246_vm0, %v245_v5, %v229_v23 }
  0xe8   :  { %v711_v49 = vld [vmem:[#allocation3 + $0x2d] sm:$0x1]  ;;  %v636_v52 = vrot.slane %v617_v48, 3  ;;  %v805_v53 = vld [vmem:[#allocation3 + $0x2e] sm:$0x1] }
  0xe9   :  { %v355_v50 = vsel %vm258_vm4, %v354_v44, %v353_v12  ;;  %v449_v51 = vsel %vm258_vm4, %v448_v45, %v447_v13  ;;  %v543_v54 = vsel %vm258_vm4, %v542_v47, %v541_v16  ;;  %v730_v55 = vrot.slane %v711_v49, 3  ;;  %v234_v2 = vld [vmem:[#allocation3 + $0x28] sm:$0x1] }
  0xea   :  { %v824_v56 = vrot.slane %v805_v53, 3  ;;  %v637_v57 = vsel %vm258_vm4, %v636_v52, %v635_v28  ;;  %v254_v28 = vrot.slane %v233_v1, 4  ;;  %v257_v42 = vrot.slane %v234_v2, 3 }
  0xeb   :  { %v731_v61 = vsel %vm258_vm4, %v730_v55, %v729_v38  ;;  %v250_v44 = vsel %vm249_vm1, %v248_v9, %v247_v40  ;;  %v284_v55 = vpop.f32.mrf.mxu1 }
  0xec   :  { %v178_v58 = vpop.f32.mrf.mxu0  ;;  %v825_v62 = vsel %vm258_vm4, %v824_v56, %v823_v39  ;;  %v253_v48 = vsel %vm252_vm2, %v251_v14, %v250_v44 }
  0xed   :  { %v179_v63 = vadd.f32 %v1501_v41, %v178_v58 }
  0xee   :  { %v336_v3 = vld [vmem:[#allocation3 + $0x31] sm:$0x1]  ;;  %v430_v4 = vld [vmem:[#allocation3 + $0x32] sm:$0x1]  ;;  %v524_v8 = vld [vmem:[#allocation3 + $0x33] sm:$0x1] }
  0xef   :  { %188 = vst [vmem:[#allocation3 + $0x38] sm:$0xff] %v179_v63  ;;  %v356_v6 = vrot.slane %v336_v3, 2  ;;  %v450_v7 = vrot.slane %v430_v4, 2  ;;  %v544_v10 = vrot.slane %v524_v8, 2  ;;  %v618_v11 = vld [vmem:[#allocation3 + $0x34] sm:$0x1] }
  0xf0   :  { %v712_v12 = vld [vmem:[#allocation3 + $0x35] sm:$0x1]  ;;  %v235_v13 = vld [vmem:[#allocation3 + $0x30] sm:$0x1]  ;;  %v638_v16 = vrot.slane %v618_v11, 2 }
  0xf1   :  { %v357_v15 = vsel %vm261_vm5, %v356_v6, %v355_v50  ;;  %v451_v41 = vsel %vm261_vm5, %v450_v7, %v449_v51  ;;  %v806_v18 = vld [vmem:[#allocation3 + $0x36] sm:$0x1]  ;;  %v545_v34 = vsel %vm261_vm5, %v544_v10, %v543_v54  ;;  %v732_v38 = vrot.slane %v712_v12, 2 }
  0xf2   :  { %v826_v39 = vrot.slane %v806_v18, 2  ;;  %v639_v43 = vsel %vm261_vm5, %v638_v16, %v637_v57  ;;  %v260_v45 = vrot.slane %v235_v13, 2  ;;  %v256_v50 = vsel %vm255_vm3, %v254_v28, %v253_v48 }
  0xf3   :  { %v733_v46 = vsel %vm261_vm5, %v732_v38, %v731_v61  ;;  %v259_v53 = vsel %vm258_vm4, %v257_v42, %v256_v50  ;;  %v287_v11 = vmul.f32 0.9, %v1412_v32 }
  0xf4   :  { %v827_v47 = vsel %vm261_vm5, %v826_v39, %v825_v62  ;;  %v262_v59 = vsel %vm261_vm5, %v260_v45, %v259_v53 }
  0xf6   :  { %v236_v49 = vld [vmem:[#allocation3 + $0x38] sm:$0x1]  ;;  %v337_v51 = vld [vmem:[#allocation3 + $0x39] sm:$0x1]  ;;  %v431_v52 = vld [vmem:[#allocation3 + $0x3a] sm:$0x1] }
  0xf7   :  { %v263_v54 = vrot.slane %v236_v49, 1  ;;  %v358_v56 = vrot.slane %v337_v51, 1  ;;  %v452_v57 = vrot.slane %v431_v52, 1  ;;  %v525_v58 = vld [vmem:[#allocation3 + $0x3b] sm:$0x1] }
  0xf8   :  { %v546_v60 = vrot.slane %v525_v58, 1  ;;  %v619_v61 = vld [vmem:[#allocation3 + $0x3c] sm:$0x1]  ;;  %v713_v62 = vld [vmem:[#allocation3 + $0x3d] sm:$0x1] }
  0xf9   :  { %v265_v63 = vsel %vm264_vm6, %v263_v54, %v262_v59  ;;  %v359_v0 = vsel %vm264_vm6, %v358_v56, %v357_v15  ;;  %v1556_v1 = vsel %vm264_vm6, %v452_v57, %v451_v41  ;;  %v640_v2 = vrot.slane %v619_v61, 1  ;;  %v807_v3 = vld [vmem:[#allocation3 + $0x3e] sm:$0x1] }
  0xfa   :  { %v285_v4 = vadd.f32 %v284_v55, %v265_v63  ;;  %v1559_v5 = vsel %vm264_vm6, %v546_v60, %v545_v34  ;;  %v734_v6 = vrot.slane %v713_v62, 1  ;;  %v828_v7 = vrot.slane %v807_v3, 1 }
  0xfb   :  { %v1562_v8 = vsel %vm264_vm6, %v640_v2, %v639_v43 }
  0xfc   :  { %1077 = vtanh.f32 %v285_v4  ;;  %v1565_v9 = vsel %vm264_vm6, %v734_v6, %v733_v46  ;;  %v1568_v10 = vsel %vm264_vm6, %v828_v7, %v827_v47 }
 0x102   :  { %v1078_v12 = vpop.eup %1077 }
 0x103   :  { %v289_v13 = vmul.f32 0.1, %v1078_v12 }
 0x105   :  { %v290_v14 = vadd.f32 %v289_v13, %v287_v11 }
 0x107   :  { %306 = vst [vmem:[#allocation13 + $0x1] sm:$0x1] %v290_v14  ;;  %377 = vmatmul.f32.vlgmr.msra.gmra.mxu3 %v290_v14  ;;  %v292_v15 = vrot.slane %v290_v14, 1  ;;  %v293_v41 = vrot.slane %v290_v14, 2  ;;  %v294_v16 = vrot.slane %v290_v14, 3  ;;  %v295_v18 = vrot.slane %v290_v14, 4 }
 0x108   :  { %737 = vmatpush.msra.mxu3 %v1350_v17  ;;  %v296_v23 = vrot.slane %v290_v14, 5  ;;  %v297_v28 = vrot.slane %v290_v14, 6  ;;  %v298_v34 = vrot.slane %v290_v14, 7 }
 0x109   :  { %307 = vst [vmem:[#allocation13 + $0x9] sm:$0x1] %v292_v15  ;;  %v971_v15 = vld [vmem:[#allocation12 + $0x68] sm:$0xff] }
 0x10a   :  { %738 = vmatpush.msra.mxu3 %v1356_v19  ;;  %308 = vst [vmem:[#allocation13 + $0x11] sm:$0x1] %v293_v41  ;;  %v970_v41 = vld [vmem:[#allocation12 + $0x60] sm:$0xff] }
 0x10b   :  { %309 = vst [vmem:[#allocation13 + $0x19] sm:$0x1] %v294_v16  ;;  %v969_v16 = vld [vmem:[#allocation12 + $0x58] sm:$0xff] }
 0x10c   :  { %739 = vmatpush.msra.mxu3 %v1359_v20  ;;  %310 = vst [vmem:[#allocation13 + $0x21] sm:$0x1] %v295_v18 }
 0x10d   :  { %311 = vst [vmem:[#allocation13 + $0x29] sm:$0x1] %v296_v23 }
 0x10e   :  { %740 = vmatpush.msra.mxu3 %v1361_v21  ;;  %312 = vst [vmem:[#allocation13 + $0x31] sm:$0x1] %v297_v28  ;;  %v381_v21 = vmul.f32 0.9, %v290_v14  ;;  %v972_v14 = vld [vmem:[#allocation12 + $0x70] sm:$0xff] }
 0x10f   :  { %313 = vst [vmem:[#allocation13 + $0x39] sm:$0x1] %v298_v34 }
 0x110   :  { %741 = vmatpush.msra.mxu3 %v1367_v22 }
 0x112   :  { %742 = vmatpush.msra.mxu3 %v1377_v24 }
 0x114   :  { %743 = vmatpush.msra.mxu3 %v1382_v25 }
 0x116   :  { %744 = vmatpush.msra.mxu3 %v1384_v26 }
 0x118   :  { %745 = vmatpush.msra.mxu3 %v1390_v27 }
 0x11a   :  { %746 = vmatpush.msra.mxu3 %v1400_v29 }
 0x11c   :  { %747 = vmatpush.msra.mxu3 %v1405_v30 }
 0x11e   :  { %748 = vmatpush.msra.mxu3 %v1407_v31 }
 0x120   :  { %749 = vmatpush.msra.mxu3 %v1415_v33 }
 0x122   :  { %750 = vmatpush.msra.mxu3 %v1422_v35 }
 0x124   :  { %751 = vmatpush.msra.mxu3 %v1428_v36 }
 0x126   :  { %752 = vmatpush.msra.mxu3 %v1433_v37 }
 0x18a   :  { %v378_v17 = vpop.f32.mrf.mxu3 }
 0x18b   :  { %v379_v19 = vadd.f32 %v378_v17, %v359_v0 }
 0x18d   :  { %1079 = vtanh.f32 %v379_v19 }
 0x193   :  { %v1080_v20 = vpop.eup %1079 }
 0x194   :  { %v383_v22 = vmul.f32 0.1, %v1080_v20 }
 0x196   :  { %v384_v24 = vadd.f32 %v383_v22, %v381_v21 }
 0x198   :  { %400 = vst [vmem:[#allocation13 + $0x2] sm:$0x1] %v384_v24  ;;  %471 = vmatmul.f32.vlgmr.msrb.gmra.mxu3 %v384_v24  ;;  %v386_v25 = vrot.slane %v384_v24, 1  ;;  %v387_v26 = vrot.slane %v384_v24, 2  ;;  %v388_v27 = vrot.slane %v384_v24, 3  ;;  %v389_v29 = vrot.slane %v384_v24, 4 }
 0x199   :  { %v390_v30 = vrot.slane %v384_v24, 5  ;;  %v391_v31 = vrot.slane %v384_v24, 6  ;;  %v392_v33 = vrot.slane %v384_v24, 7  ;;  %v475_v38 = vmul.f32 0.9, %v384_v24 }
 0x19a   :  { %401 = vst [vmem:[#allocation13 + $0xa] sm:$0x1] %v386_v25 }
 0x19b   :  { %402 = vst [vmem:[#allocation13 + $0x12] sm:$0x1] %v387_v26 }
 0x19c   :  { %403 = vst [vmem:[#allocation13 + $0x1a] sm:$0x1] %v388_v27 }
 0x19d   :  { %404 = vst [vmem:[#allocation13 + $0x22] sm:$0x1] %v389_v29  ;;  %v967_v29 = vld [vmem:[#allocation12 + $0x48] sm:$0xff] }
 0x19e   :  { %405 = vst [vmem:[#allocation13 + $0x2a] sm:$0x1] %v390_v30  ;;  %v966_v30 = vld [vmem:[#allocation12 + $0x40] sm:$0xff] }
 0x19f   :  { %406 = vst [vmem:[#allocation13 + $0x32] sm:$0x1] %v391_v31  ;;  %v965_v31 = vld [vmem:[#allocation12 + $0x38] sm:$0xff] }
 0x1a0   :  { %407 = vst [vmem:[#allocation13 + $0x3a] sm:$0x1] %v392_v33  ;;  %v964_v33 = vld [vmem:[#allocation12 + $0x30] sm:$0xff] }
 0x21b   :  { %v472_v35 = vpop.f32.mrf.mxu3 }
 0x21c   :  { %v473_v36 = vadd.f32 %v472_v35, %v1556_v1  ;;  %v963_v35 = vld [vmem:[#allocation12 + $0x28] sm:$0xff] }
 0x21e   :  { %1081 = vtanh.f32 %v473_v36  ;;  %v962_v36 = vld [vmem:[#allocation12 + $0x20] sm:$0xff] }
 0x224   :  { %v1082_v37 = vpop.eup %1081 }
 0x225   :  { %v477_v39 = vmul.f32 0.1, %v1082_v37  ;;  %v961_v37 = vld [vmem:[#allocation12 + $0x18] sm:$0xff] }
 0x227   :  { %v478_v40 = vadd.f32 %v477_v39, %v475_v38  ;;  %v960_v38 = vld [vmem:[#allocation12 + $0x10] sm:$0xff]  ;;  %v191_v39 = vrot.slane %v1412_v32, 1 }
 0x229   :  { %494 = vst [vmem:[#allocation13 + $0x3] sm:$0x1] %v478_v40  ;;  %565 = vmatmul.f32.vlgmr.msrb.gmra.mxu1 %v478_v40  ;;  %v480_v42 = vrot.slane %v478_v40, 1  ;;  %v481_v43 = vrot.slane %v478_v40, 2  ;;  %v482_v44 = vrot.slane %v478_v40, 3  ;;  %v483_v45 = vrot.slane %v478_v40, 4 }
 0x22a   :  { %v484_v46 = vrot.slane %v478_v40, 5  ;;  %v485_v47 = vrot.slane %v478_v40, 6  ;;  %v486_v48 = vrot.slane %v478_v40, 7  ;;  %v569_v52 = vmul.f32 0.9, %v478_v40 }
 0x22b   :  { %495 = vst [vmem:[#allocation13 + $0xb] sm:$0x1] %v480_v42  ;;  %v192_v40 = vrot.slane %v1412_v32, 2  ;;  %v193_v42 = vrot.slane %v1412_v32, 3 }
 0x22c   :  { %496 = vst [vmem:[#allocation13 + $0x13] sm:$0x1] %v481_v43  ;;  %v194_v43 = vrot.slane %v1412_v32, 4 }
 0x22d   :  { %497 = vst [vmem:[#allocation13 + $0x1b] sm:$0x1] %v482_v44  ;;  %v959_v44 = vld [vmem:[#allocation12 + $0x8] sm:$0xff] }
 0x22e   :  { %498 = vst [vmem:[#allocation13 + $0x23] sm:$0x1] %v483_v45  ;;  %v195_v45 = vrot.slane %v1412_v32, 5 }
 0x22f   :  { %499 = vst [vmem:[#allocation13 + $0x2b] sm:$0x1] %v484_v46  ;;  %v196_v46 = vrot.slane %v1412_v32, 6 }
 0x230   :  { %500 = vst [vmem:[#allocation13 + $0x33] sm:$0x1] %v485_v47  ;;  %v958_v47 = vld [vmem:[#allocation12] sm:$0xff] }
 0x231   :  { %501 = vst [vmem:[#allocation13 + $0x3b] sm:$0x1] %v486_v48  ;;  %v197_v48 = vrot.slane %v1412_v32, 7 }
 0x232   :  { %206 = vst [vmem:[#allocation13 + $0x8] sm:$0x1] %v191_v39 }
 0x233   :  { %207 = vst [vmem:[#allocation13 + $0x10] sm:$0x1] %v192_v40 }
 0x234   :  { %208 = vst [vmem:[#allocation13 + $0x18] sm:$0x1] %v193_v42 }
 0x235   :  { %209 = vst [vmem:[#allocation13 + $0x20] sm:$0x1] %v194_v43 }
 0x236   :  { %210 = vst [vmem:[#allocation13 + $0x28] sm:$0x1] %v195_v45 }
 0x237   :  { %211 = vst [vmem:[#allocation13 + $0x30] sm:$0x1] %v196_v46 }
 0x238   :  { %212 = vst [vmem:[#allocation13 + $0x38] sm:$0x1] %v197_v48 }
 0x2a6   :  { %v566_v49 = vpop.f32.mrf.mxu1 }
 0x2a7   :  { %v567_v50 = vadd.f32 %v566_v49, %v1559_v5 }
 0x2a9   :  { %1083 = vtanh.f32 %v567_v50 }
 0x2af   :  { %v1084_v51 = vpop.eup %1083 }
 0x2b0   :  { %v571_v53 = vmul.f32 0.1, %v1084_v51 }
 0x2b2   :  { %v572_v54 = vadd.f32 %v571_v53, %v569_v52 }
 0x2b4   :  { %588 = vst [vmem:[#allocation13 + $0x4] sm:$0x1] %v572_v54  ;;  %659 = vmatmul.f32.vlgmr.msra.gmra.mxu2 %v572_v54  ;;  %v574_v55 = vrot.slane %v572_v54, 1  ;;  %v575_v56 = vrot.slane %v572_v54, 2  ;;  %v576_v57 = vrot.slane %v572_v54, 3  ;;  %v577_v58 = vrot.slane %v572_v54, 4 }
 0x2b5   :  { %v578_v59 = vrot.slane %v572_v54, 5  ;;  %v579_v60 = vrot.slane %v572_v54, 6  ;;  %v580_v61 = vrot.slane %v572_v54, 7  ;;  %v663_v1 = vmul.f32 0.9, %v572_v54 }
 0x2b6   :  { %589 = vst [vmem:[#allocation13 + $0xc] sm:$0x1] %v574_v55 }
 0x2b7   :  { %590 = vst [vmem:[#allocation13 + $0x14] sm:$0x1] %v575_v56 }
 0x2b8   :  { %591 = vst [vmem:[#allocation13 + $0x1c] sm:$0x1] %v576_v57 }
 0x2b9   :  { %592 = vst [vmem:[#allocation13 + $0x24] sm:$0x1] %v577_v58 }
 0x2ba   :  { %593 = vst [vmem:[#allocation13 + $0x2c] sm:$0x1] %v578_v59 }
 0x2bb   :  { %594 = vst [vmem:[#allocation13 + $0x34] sm:$0x1] %v579_v60 }
 0x2bc   :  { %595 = vst [vmem:[#allocation13 + $0x3c] sm:$0x1] %v580_v61 }
 0x337   :  { %v660_v62 = vpop.f32.mrf.mxu2 }
 0x338   :  { %v661_v63 = vadd.f32 %v660_v62, %v1562_v8  ;;  %v973_v8 = vld [vmem:[#allocation12 + $0x78] sm:$0xff] }
 0x339   :  { %978 = vmatpush.msrb.mxu2 %v973_v8 }
 0x33a   :  { %1085 = vtanh.f32 %v661_v63 }
 0x33b   :  { %979 = vmatpush.msrb.mxu2 %v972_v14 }
 0x33d   :  { %980 = vmatpush.msrb.mxu2 %v971_v15 }
 0x33f   :  { %981 = vmatpush.msrb.mxu2 %v970_v41 }
 0x340   :  { %v1086_v0 = vpop.eup %1085 }
 0x341   :  { %v665_v2 = vmul.f32 0.1, %v1086_v0  ;;  %982 = vmatpush.msrb.mxu2 %v969_v16 }
 0x343   :  { %v666_v3 = vadd.f32 %v665_v2, %v663_v1 }
 0x345   :  { %682 = vst [vmem:[#allocation13 + $0x5] sm:$0x1] %v666_v3  ;;  %753 = vmatmul.f32.vlgmr.msra.gmra.mxu3 %v666_v3  ;;  %v668_v4 = vrot.slane %v666_v3, 1  ;;  %v669_v5 = vrot.slane %v666_v3, 2  ;;  %v670_v6 = vrot.slane %v666_v3, 3  ;;  %v671_v7 = vrot.slane %v666_v3, 4 }
 0x346   :  { %v672_v11 = vrot.slane %v666_v3, 5  ;;  %v673_v12 = vrot.slane %v666_v3, 6  ;;  %v674_v13 = vrot.slane %v666_v3, 7  ;;  %v757_v34 = vmul.f32 0.9, %v666_v3 }
 0x347   :  { %683 = vst [vmem:[#allocation13 + $0xd] sm:$0x1] %v668_v4 }
 0x348   :  { %684 = vst [vmem:[#allocation13 + $0x15] sm:$0x1] %v669_v5  ;;  %v1076_v5 = vld [vmem:[%s1620_s6] ss:$0 sm:$0xff]  ;;  %s1277_s6 = smov [#allocation14]  }
 0x349   :  { %685 = vst [vmem:[#allocation13 + $0x1d] sm:$0x1] %v670_v6  ;;  %s1044_s7 = sshll.u32 %s1277_s6, 4  ;;  %s1045_s7 = int_to_ptr.vmem [resolvable:$true] %s1044_s7 }
 0x34a   :  { %686 = vst [vmem:[#allocation13 + $0x25] sm:$0x1] %v671_v7 }
 0x34b   :  { %687 = vst [vmem:[#allocation13 + $0x2d] sm:$0x1] %v672_v11 }
 0x34c   :  { %688 = vst [vmem:[#allocation13 + $0x35] sm:$0x1] %v673_v12 }
 0x34d   :  { %689 = vst [vmem:[#allocation13 + $0x3d] sm:$0x1] %v674_v13 }
 0x3c8   :  { %v754_v18 = vpop.f32.mrf.mxu3 }
 0x3c9   :  { %v755_v23 = vadd.f32 %v754_v18, %v1565_v9  ;;  %v968_v9 = vld [vmem:[#allocation12 + $0x50] sm:$0xff] }
 0x3ca   :  { %983 = vmatpush.msrb.mxu2 %v968_v9 }
 0x3cb   :  { %1087 = vtanh.f32 %v755_v23 }
 0x3cc   :  { %984 = vmatpush.msrb.mxu2 %v967_v29 }
 0x3ce   :  { %985 = vmatpush.msrb.mxu2 %v966_v30 }
 0x3d0   :  { %986 = vmatpush.msrb.mxu2 %v965_v31 }
 0x3d1   :  { %v1088_v28 = vpop.eup %1087 }
 0x3d2   :  { %v759_v17 = vmul.f32 0.1, %v1088_v28  ;;  %987 = vmatpush.msrb.mxu2 %v964_v33 }
 0x3d4   :  { %v760_v19 = vadd.f32 %v759_v17, %v757_v34  ;;  %988 = vmatpush.msrb.mxu2 %v963_v35 }
 0x3d6   :  { %776 = vst [vmem:[#allocation13 + $0x6] sm:$0x1] %v760_v19  ;;  %847 = vmatmul.f32.vlgmr.msrb.gmra.mxu0 %v760_v19  ;;  %v762_v20 = vrot.slane %v760_v19, 1  ;;  %v763_v21 = vrot.slane %v760_v19, 2  ;;  %v764_v22 = vrot.slane %v760_v19, 3  ;;  %v765_v24 = vrot.slane %v760_v19, 4  ;;  %989 = vmatpush.msrb.mxu2 %v962_v36 }
 0x3d7   :  { %v766_v25 = vrot.slane %v760_v19, 5  ;;  %v767_v26 = vrot.slane %v760_v19, 6  ;;  %v768_v27 = vrot.slane %v760_v19, 7  ;;  %v851_v52 = vmul.f32 0.9, %v760_v19 }
 0x3d8   :  { %777 = vst [vmem:[#allocation13 + $0xe] sm:$0x1] %v762_v20  ;;  %990 = vmatpush.msrb.mxu2 %v961_v37 }
 0x3d9   :  { %778 = vst [vmem:[#allocation13 + $0x16] sm:$0x1] %v763_v21 }
 0x3da   :  { %779 = vst [vmem:[#allocation13 + $0x1e] sm:$0x1] %v764_v22  ;;  %991 = vmatpush.msrb.mxu2 %v960_v38 }
 0x3db   :  { %780 = vst [vmem:[#allocation13 + $0x26] sm:$0x1] %v765_v24 }
 0x3dc   :  { %781 = vst [vmem:[#allocation13 + $0x2e] sm:$0x1] %v766_v25  ;;  %992 = vmatpush.msrb.mxu2 %v959_v44 }
 0x3dd   :  { %782 = vst [vmem:[#allocation13 + $0x36] sm:$0x1] %v767_v26 }
 0x3de   :  { %783 = vst [vmem:[#allocation13 + $0x3e] sm:$0x1] %v768_v27  ;;  %993 = vmatpush.msrb.mxu2 %v958_v47 }
 0x453   :  { %v848_v49 = vpop.f32.mrf.mxu0 }
 0x454   :  { %v849_v50 = vadd.f32 %v848_v49, %v1568_v10 }
 0x456   :  { %1089 = vtanh.f32 %v849_v50 }
 0x45c   :  { %v1090_v51 = vpop.eup %1089 }
 0x45d   :  { %v853_v53 = vmul.f32 0.1, %v1090_v51 }
 0x45f   :  { %v854_v54 = vadd.f32 %v853_v53, %v851_v52 }
 0x461   :  { %870 = vst [vmem:[#allocation13 + $0x7] sm:$0x1] %v854_v54  ;;  %941 = vmatmul.f32.vlgmr.msra.gmra.mxu1 %v854_v54  ;;  %v856_v55 = vrot.slane %v854_v54, 1  ;;  %v857_v56 = vrot.slane %v854_v54, 2  ;;  %v858_v57 = vrot.slane %v854_v54, 3  ;;  %v859_v32 = vrot.slane %v854_v54, 4 }
 0x462   :  { %v860_v58 = vrot.slane %v854_v54, 5  ;;  %v861_v59 = vrot.slane %v854_v54, 6  ;;  %v862_v60 = vrot.slane %v854_v54, 7 }
 0x463   :  { %871 = vst [vmem:[#allocation13 + $0xf] sm:$0x1] %v856_v55 }
 0x464   :  { %872 = vst [vmem:[#allocation13 + $0x17] sm:$0x1] %v857_v56 }
 0x465   :  { %873 = vst [vmem:[#allocation13 + $0x1f] sm:$0x1] %v858_v57 }
 0x466   :  { %874 = vst [vmem:[#allocation13 + $0x27] sm:$0x1] %v859_v32 }
 0x467   :  { %875 = vst [vmem:[#allocation13 + $0x2f] sm:$0x1] %v860_v58 }
 0x468   :  { %v950_v10 = vld [vmem:[#allocation13] sm:$0xff]  ;;  %876 = vst [vmem:[#allocation13 + $0x37] sm:$0x1] %v861_v59 }
 0x469   :  { %994 = vmatmul.f32.vlgmr.msrb.gmra.mxu2 %v950_v10  ;;  %877 = vst [vmem:[#allocation13 + $0x3f] sm:$0x1] %v862_v60 }
 0x46a   :  { %v951_v61 = vld [vmem:[#allocation13 + $0x8] sm:$0xff]  ;;  %1039 = dma.vmem_to_hbm [thread:$0]  %s1032_s10, 1024, %s1034_s30, [#allocation6], %s1270_s13, %s1270_s13, %s1271_s14  }
 0x46b   :  { %v952_v62 = vld [vmem:[#allocation13 + $0x10] sm:$0xff] }
 0x46c   :  { %v953_v63 = vld [vmem:[#allocation13 + $0x18] sm:$0xff] }
 0x46d   :  { %v954_v0 = vld [vmem:[#allocation13 + $0x20] sm:$0xff] }
 0x46e   :  { %v955_v1 = vld [vmem:[#allocation13 + $0x28] sm:$0xff] }
 0x46f   :  { %v956_v2 = vld [vmem:[#allocation13 + $0x30] sm:$0xff] }
 0x470   :  { %v957_v3 = vld [vmem:[#allocation13 + $0x38] sm:$0xff] }
 0x471   :  { %997 = vmatmul.f32.gmra.mxu2 %v951_v61 }
 0x479   :  { %1000 = vmatmul.f32.gmra.mxu2 %v952_v62 }
 0x481   :  { %1003 = vmatmul.f32.gmra.mxu2 %v953_v63 }
 0x489   :  { %1006 = vmatmul.f32.gmra.mxu2 %v954_v0 }
 0x491   :  { %1009 = vmatmul.f32.gmra.mxu2 %v955_v1 }
 0x499   :  { %1012 = vmatmul.f32.gmra.mxu2 %v956_v2 }
 0x4a1   :  { %1015 = vmatmul.f32.gmra.mxu2 %v957_v3 }
 0x4de   :  { %v942_v4 = vpop.f32.mrf.mxu1 }
 0x4ec   :  { %v995_v6 = vpop.f32.mrf.mxu2 }
 0x4ed   :  { %v996_v7 = vadd.f32 %v1076_v5, %v995_v6 }
 0x4ef   :  { %1019 = vst [vmem:[#allocation14] sm:$0xff] %v996_v7 }
 0x4f4   :  { %v998_v11 = vpop.f32.mrf.mxu2 }
 0x4f5   :  { %v999_v12 = vadd.f32 %v1076_v5, %v998_v11 }
 0x4f7   :  { %1020 = vst [vmem:[#allocation14 + $0x8] sm:$0xff] %v999_v12 }
 0x4fc   :  { %v1001_v13 = vpop.f32.mrf.mxu2 }
 0x4fd   :  { %v1002_v8 = vadd.f32 %v1076_v5, %v1001_v13 }
 0x4ff   :  { %1021 = vst [vmem:[#allocation14 + $0x10] sm:$0xff] %v1002_v8 }
 0x504   :  { %v1004_v14 = vpop.f32.mrf.mxu2 }
 0x505   :  { %v1005_v15 = vadd.f32 %v1076_v5, %v1004_v14 }
 0x507   :  { %1022 = vst [vmem:[#allocation14 + $0x18] sm:$0xff] %v1005_v15 }
 0x50c   :  { %v1007_v41 = vpop.f32.mrf.mxu2 }
 0x50d   :  { %v1008_v16 = vadd.f32 %v1076_v5, %v1007_v41 }
 0x50f   :  { %1023 = vst [vmem:[#allocation14 + $0x20] sm:$0xff] %v1008_v16 }
 0x514   :  { %v1010_v18 = vpop.f32.mrf.mxu2 }
 0x515   :  { %v1011_v23 = vadd.f32 %v1076_v5, %v1010_v18 }
 0x517   :  { %1024 = vst [vmem:[#allocation14 + $0x28] sm:$0xff] %v1011_v23 }
 0x51c   :  { %v1013_v28 = vpop.f32.mrf.mxu2 }
 0x51d   :  { %v1014_v34 = vadd.f32 %v1076_v5, %v1013_v28 }
 0x51f   :  { %1025 = vst [vmem:[#allocation14 + $0x30] sm:$0xff] %v1014_v34 }
 0x524   :  { %v1016_v17 = vpop.f32.mrf.mxu2 }
 0x525   :  { %v1017_v19 = vadd.f32 %v1076_v5, %v1016_v17 }
 0x527   :  { %1026 = vst [vmem:[#allocation14 + $0x38] sm:$0xff] %v1017_v19 }
 0x528   :  { %1052 = dma.vmem_to_hbm [thread:$0]  %s1045_s7, 1024, %s1047_s17, [#allocation15], %s1270_s13, %s1270_s13, %s1271_s14  }
 0x529   :  { %1265 = dma.done.wait [#allocation6], 1024  }
 0x52a   :  { %1266 = vsyncadd [#allocation6], 4294966272 }
 0x52b   :  { %1267 = dma.done.wait [#allocation15], 1024  }
 0x52c   :  { %1268 = vsyncadd [#allocation15], 4294966272 }
 0x52d   :  { %1061 = vsyncpa [#allocation5], 1 }
 0x52e   :  { %1062 = vsyncpa [#allocation8], 1 }
 0x52f   :  { %1063 = vsyncpa [#allocation11], 1 }
 0x530   :  { %1064 = vsyncpa [#allocation6], 1 }
 0x531   :  { %1065 = vsyncpa [#allocation15], 1 }

</bundles_post_ra>
